<compile_context>
chip_gen: v7x
topology: tpu7x:2x2x1
jax: 0.10.0
libtpu: 0.0.40
codegen_flags: <defaults>
</compile_context>

<pallas_src>
import functools

import jax
import jax.numpy as jnp
from jax.experimental import pallas as pl
from jax.experimental.pallas import tpu as pltpu


# ------------------------- fused LSTM + decoder kernel -------------------------
def _lstm_fused_kernel(x_ref, len_ref, w_ih_ref, w_hh_ref, b_ref,
                       w_fc_ref, b_fc_ref, out_ref, h_scr, c_scr, pre_scr,
                       *, t_block, hidden):
    """One grid step == `t_block` LSTM time steps for one batch tile.

    x_ref    : (T, Bt, D)       time-major input block for this (batch, time) tile
    len_ref  : (Bt, 1)          int32 sequence lengths
    w_ih_ref : (D, 4H)          input->gate weights (PyTorch gate order i, f, g, o)
    w_hh_ref : (H, 4H)          hidden->gate weights
    b_ref    : (1, 4H)          combined bias (b_ih + b_hh)
    w_fc_ref : (H, C)           decoder weights
    b_fc_ref : (1, C)           decoder bias
    out_ref  : (Bt, C)          logits (written once, at the last time block)
    h_scr, c_scr : (Bt, H)      f32 VMEM scratch, persistent across the time axis
    pre_scr  : (T, Bt, 4H)      f32 VMEM staging for the hoisted input projection
    """
    t = pl.program_id(1)
    H = hidden
    Bt = h_scr.shape[0]

    @pl.when(t == 0)
    def _():
        h_scr[...] = jnp.zeros_like(h_scr)
        c_scr[...] = jnp.zeros_like(c_scr)

    # ---- hoisted input projection: one big (T*Bt, D) x (D, 4H) MXU matmul ----
    x_blk = x_ref[...]                                           # (T, Bt, D)
    D = x_blk.shape[-1]
    pre = jnp.dot(x_blk.reshape(t_block * Bt, D), w_ih_ref[...],
                  preferred_element_type=jnp.float32) + b_ref[...]
    pre_scr[...] = pre.reshape(t_block, Bt, 4 * H)               # time-major staging

    w_hh = w_hh_ref[...]
    lens = len_ref[...]                                          # (Bt, 1) int32
    t0 = t * t_block

    # Constant lane mask (hoisted): fold tanh(g) into the same sigmoid pass via
    # tanh(z) = 2*sigmoid(2z) - 1  ->  pre-scale g-lanes by 2, post-fix 2s-1.
    lane = jax.lax.broadcasted_iota(jnp.int32, (1, 4 * H), 1)
    gate_scale = jnp.where((lane >= 2 * H) & (lane < 3 * H),
                           jnp.float32(2.0), jnp.float32(1.0))

    h = h_scr[...]
    c = c_scr[...]
    # Fully unrolled recurrence (t_block static); h/c live in vregs all block.
    for j in range(t_block):
        gates = pre_scr[j] + jnp.dot(h, w_hh,
                                     preferred_element_type=jnp.float32)
        s = jax.nn.sigmoid(gates * gate_scale)   # ONE full-width (Bt, 4H) EUP pass
        i_g = s[:, 0 * H:1 * H]
        f_g = s[:, 1 * H:2 * H]
        g_g = 2.0 * s[:, 2 * H:3 * H] - 1.0      # tanh recovered on the VPU
        o_g = s[:, 3 * H:4 * H]
        c_new = f_g * c + i_g * g_g
        h_new = o_g * jnp.tanh(c_new)
        upd = (t0 + j) < lens                    # (Bt, 1): freeze state past doc_len
        c = jnp.where(upd, c_new, c)
        h = jnp.where(upd, h_new, h)

    h_scr[...] = h
    c_scr[...] = c

    # ---- fused FC decoder on the last time block (dropout = identity) ----
    @pl.when(t == pl.num_programs(1) - 1)
    def _():
        out_ref[...] = (jnp.dot(h, w_fc_ref[...],
                                preferred_element_type=jnp.float32)
                        + b_fc_ref[...])


# --------------------------------- wrapper --------------------------------------
def lstm_forward(x_bsd, doc_len, params, *, t_block=None, b_block=None):
    """Forward of the LSTM module: encoder -> dropout(identity) -> FC decoder.

    x_bsd  : (B, S, D) float32, batch-major input features.
    doc_len: (B,) int   true sequence lengths (state frozen past doc_len[b]).
    Returns logits (B, C).
    """
    # TODO(synk): LSTMSingleEncoder internals are not given; we assume a standard
    # single-layer LSTM with the last *valid* hidden state fed to the decoder.
    B, S, D = x_bsd.shape
    H = params["w_hh"].shape[0]
    C = params["w_fc"].shape[1]

    if b_block is None:
        b_block = B if B <= 8 else 8        # one max-size batch tile per core;
    assert B % b_block == 0                 # pass b_block=B//2 on v7x (B>=16)

    if t_block is None:
        # Full-sequence time block (time grid collapses to 1 step), capped so
        # the x block + pre scratch stay VMEM-friendly for long sequences.
        t_block = min(max(S, 1), 128)

    # Pad the time axis to a multiple of t_block; padded steps are masked out
    # by doc_len inside the kernel, so results are unaffected.
    s_pad = t_block * pl.cdiv(S, t_block)
    if s_pad != S:
        x_bsd = jnp.pad(x_bsd, ((0, 0), (0, s_pad - S), (0, 0)))

    # Time-major layout so the per-step pre-gate slab is a free static view.
    x_tbd = jnp.transpose(x_bsd, (1, 0, 2))           # (S_pad, B, D)

    doc_len_2d = doc_len.astype(jnp.int32).reshape(B, 1)
    bias_2d = params["b"].reshape(1, 4 * H)
    b_fc_2d = params["b_fc"].reshape(1, C)

    grid = (B // b_block, s_pad // t_block)
    kernel = functools.partial(_lstm_fused_kernel, t_block=t_block, hidden=H)

    # Explicit VMEM budget (double-buffered x block + weights + scratch),
    # binding first on v7x's 64 MiB physical VMEM.
    f32 = 4
    est = (2 * t_block * b_block * D * f32                        # x (dbl-buffered)
           + 2 * (D * 4 * H + H * 4 * H + 4 * H + H * C + C) * f32  # weights/biases
           + t_block * b_block * 4 * H * f32                      # pre scratch
           + 2 * b_block * H * f32                                # h, c scratch
           + 2 * b_block * C * f32)                               # out
    vmem_limit = int(min(max(2 * est, 8 << 20), 60 << 20))

    return pl.pallas_call(
        kernel,
        out_shape=jax.ShapeDtypeStruct((B, C), jnp.float32),
        grid_spec=pltpu.PrefetchScalarGridSpec(
            num_scalar_prefetch=0,
            grid=grid,
            in_specs=[
                pl.BlockSpec((t_block, b_block, D), lambda b, t: (t, b, 0)),  # x (T-major)
                pl.BlockSpec((b_block, 1), lambda b, t: (b, 0)),              # doc_len
                pl.BlockSpec((D, 4 * H), lambda b, t: (0, 0)),                # W_ih
                pl.BlockSpec((H, 4 * H), lambda b, t: (0, 0)),                # W_hh
                pl.BlockSpec((1, 4 * H), lambda b, t: (0, 0)),                # bias
                pl.BlockSpec((H, C), lambda b, t: (0, 0)),                    # W_fc
                pl.BlockSpec((1, C), lambda b, t: (0, 0)),                    # b_fc
            ],
            out_specs=pl.BlockSpec((b_block, C), lambda b, t: (b, 0)),
            scratch_shapes=[
                pltpu.VMEM((b_block, H), jnp.float32),               # h
                pltpu.VMEM((b_block, H), jnp.float32),               # c
                pltpu.VMEM((t_block, b_block, 4 * H), jnp.float32),  # pre (time-major)
            ],
        ),
        compiler_params=pltpu.CompilerParams(
            # batch tiles are independent ("parallel" -> megacore on v7x);
            # the time axis is a sequential recurrence ("arbitrary").
            dimension_semantics=("parallel", "arbitrary"),
            vmem_limit_bytes=vmem_limit,
        ),
    )(x_tbd, doc_len_2d, params["w_ih"], params["w_hh"], bias_2d,
      params["w_fc"], b_fc_2d)


# ------------------------------ pure-JAX reference ------------------------------
def _reference_forward(x_bsd, doc_len, params):
    w_ih, w_hh, b = params["w_ih"], params["w_hh"], params["b"]
    H = w_hh.shape[0]
    B, S, _ = x_bsd.shape

    def step(carry, inp):
        h, c = carry
        x_t, t = inp
        gates = x_t @ w_ih + h @ w_hh + b
        i = jax.nn.sigmoid(gates[:, 0 * H:1 * H])
        f = jax.nn.sigmoid(gates[:, 1 * H:2 * H])
        g = jnp.tanh(gates[:, 2 * H:3 * H])
        o = jax.nn.sigmoid(gates[:, 3 * H:4 * H])
        c_new = f * c + i * g
        h_new = o * jnp.tanh(c_new)
        upd = (t < doc_len)[:, None]
        c = jnp.where(upd, c_new, c)
        h = jnp.where(upd, h_new, h)
        return (h, c), None

    h0 = jnp.zeros((B, H), jnp.float32)
    (h, _), _ = jax.lax.scan(
        step, (h0, h0),
        (jnp.transpose(x_bsd, (1, 0, 2)), jnp.arange(S, dtype=jnp.int32)))
    return h @ params["w_fc"] + params["b_fc"]


# ------------------------------------- main --------------------------------------
if __name__ == "__main__":
    B, S, D, H, C = 8, 16, 32, 32, 16   # batch, seq, input feat, hidden, classes

    key = jax.random.PRNGKey(0)
    k_x, k1, k2, k3, k4, k5 = jax.random.split(key, 6)
    scale = 1.0 / jnp.sqrt(jnp.float32(H))

    x = jax.random.normal(k_x, (B, S, D), dtype=jnp.float32)
    # Variable-length sequences exercise the doc_len masking path.
    doc_len = jnp.array([16, 16, 12, 9, 5, 14, 1, 7], dtype=jnp.int32)

    params = {
        "w_ih": jax.random.uniform(k1, (D, 4 * H), jnp.float32, -scale, scale),
        "w_hh": jax.random.uniform(k2, (H, 4 * H), jnp.float32, -scale, scale),
        "b":    jax.random.uniform(k3, (4 * H,), jnp.float32, -scale, scale),
        "w_fc": jax.random.uniform(k4, (H, C), jnp.float32, -scale, scale),
        "b_fc": jax.random.uniform(k5, (C,), jnp.float32, -scale, scale),
    }

    out = jax.block_until_ready(lstm_forward(x, doc_len, params))
    ref = jax.block_until_ready(_reference_forward(x, doc_len, params))

    assert out.shape == (B, C)
    # Tolerance covers MXU-vs-XLA matmul precision and the tanh(z)=2*sigmoid(2z)-1
    # rewrite (few-ULP difference) accumulated over the recurrence.
    assert jnp.allclose(out, ref, atol=1e-3, rtol=1e-3), "Pallas output mismatch"
    print("KERNEL_OK")
</pallas_src>

<mosaic_0001>
module attributes {stable_mosaic.version = 11 : i64} {
  func.func @_lstm_fused_kernel(%arg0: i32, %arg1: i32, %arg2: memref<16x8x32xf32, #tpu.memory_space<vmem>>, %arg3: memref<8x1xi32, #tpu.memory_space<vmem>>, %arg4: memref<32x128xf32, #tpu.memory_space<vmem>>, %arg5: memref<32x128xf32, #tpu.memory_space<vmem>>, %arg6: memref<1x128xf32, #tpu.memory_space<vmem>>, %arg7: memref<32x16xf32, #tpu.memory_space<vmem>>, %arg8: memref<1x16xf32, #tpu.memory_space<vmem>>, %arg9: memref<8x16xf32, #tpu.memory_space<vmem>>, %arg10: memref<8x32xf32, #tpu.memory_space<vmem>>, %arg11: memref<8x32xf32, #tpu.memory_space<vmem>>, %arg12: memref<16x8x128xf32, #tpu.memory_space<vmem>>) attributes {dimension_semantics = [#tpu.dimension_semantics<parallel>, #tpu.dimension_semantics<arbitrary>], iteration_bounds = array<i64: 1, 1>, scalar_prefetch = 0 : i64, scratch_operands = 3 : i64, tpu.core_type = #tpu.core_type<tc>, window_params = [{transform_indices = @transform_0, window_bounds = array<i64: 16, 8, 32>}, {transform_indices = @transform_1, window_bounds = array<i64: 8, 1>}, {pipeline_mode = #tpu.pipeline_mode<synchronous>, transform_indices = @transform_2, window_bounds = array<i64: 32, 128>}, {pipeline_mode = #tpu.pipeline_mode<synchronous>, transform_indices = @transform_3, window_bounds = array<i64: 32, 128>}, {pipeline_mode = #tpu.pipeline_mode<synchronous>, transform_indices = @transform_4, window_bounds = array<i64: 1, 128>}, {pipeline_mode = #tpu.pipeline_mode<synchronous>, transform_indices = @transform_5, window_bounds = array<i64: 32, 16>}, {pipeline_mode = #tpu.pipeline_mode<synchronous>, transform_indices = @transform_6, window_bounds = array<i64: 1, 16>}, {transform_indices = @transform_7, window_bounds = array<i64: 8, 16>}]} {
    %c0_i32 = arith.constant 0 : i32
    %0 = arith.cmpi eq, %arg1, %c0_i32 : i32
    %1 = arith.extui %0 : i1 to i32
    %c0_i32_0 = arith.constant 0 : i32
    %2 = arith.cmpi ne, %1, %c0_i32_0 : i32
    scf.if %2 {
      %cst_124 = arith.constant 0.000000e+00 : f32
      %559 = vector.broadcast %cst_124 : f32 to vector<8x32xf32>
      %c0_125 = arith.constant 0 : index
      %c0_126 = arith.constant 0 : index
      %560 = vector.load %arg10[%c0_125, %c0_126] : memref<8x32xf32, #tpu.memory_space<vmem>>, vector<8x32xf32>
      tpu.vector_store %arg10[%c0_125, %c0_126], %559 {strides = array<i32>} : memref<8x32xf32, #tpu.memory_space<vmem>>, vector<8x32xf32>,
      %cst_127 = arith.constant 0.000000e+00 : f32
      %561 = vector.broadcast %cst_127 : f32 to vector<8x32xf32>
      %c0_128 = arith.constant 0 : index
      %c0_129 = arith.constant 0 : index
      %562 = vector.load %arg11[%c0_128, %c0_129] : memref<8x32xf32, #tpu.memory_space<vmem>>, vector<8x32xf32>
      tpu.vector_store %arg11[%c0_128, %c0_129], %561 {strides = array<i32>} : memref<8x32xf32, #tpu.memory_space<vmem>>, vector<8x32xf32>,
    } else {
    }
    %c0 = arith.constant 0 : index
    %c0_1 = arith.constant 0 : index
    %c0_2 = arith.constant 0 : index
    %3 = vector.load %arg2[%c0, %c0_1, %c0_2] : memref<16x8x32xf32, #tpu.memory_space<vmem>>, vector<16x8x32xf32>
    %4 = vector.shape_cast %3 : vector<16x8x32xf32> to vector<128x32xf32>
    %c0_3 = arith.constant 0 : index
    %c0_4 = arith.constant 0 : index
    %5 = vector.load %arg4[%c0_3, %c0_4] : memref<32x128xf32, #tpu.memory_space<vmem>>, vector<32x128xf32>
    %cst = arith.constant dense<0.000000e+00> : vector<128x128xf32>
    %6 = tpu.matmul %4, %5, %cst {dimension_numbers = #tpu.dot_dimension_numbers<[1], [0], [0], [1], [0, 0, 1, 1], [], []>} : vector<128x32xf32>, vector<32x128xf32>, vector<128x128xf32> -> vector<128x128xf32>
    %c0_5 = arith.constant 0 : index
    %c0_6 = arith.constant 0 : index
    %7 = vector.load %arg6[%c0_5, %c0_6] : memref<1x128xf32, #tpu.memory_space<vmem>>, vector<1x128xf32>
    %8 = vector.broadcast %7 : vector<1x128xf32> to vector<128x128xf32>
    %9 = arith.addf %6, %8 : vector<128x128xf32>
    %10 = vector.shape_cast %9 : vector<128x128xf32> to vector<16x8x128xf32>
    %c0_7 = arith.constant 0 : index
    %c0_8 = arith.constant 0 : index
    %c0_9 = arith.constant 0 : index
    %11 = vector.load %arg12[%c0_7, %c0_8, %c0_9] : memref<16x8x128xf32, #tpu.memory_space<vmem>>, vector<16x8x128xf32>
    tpu.vector_store %arg12[%c0_7, %c0_8, %c0_9], %10 {strides = array<i32>} : memref<16x8x128xf32, #tpu.memory_space<vmem>>, vector<16x8x128xf32>,
    %c0_10 = arith.constant 0 : index
    %c0_11 = arith.constant 0 : index
    %12 = vector.load %arg5[%c0_10, %c0_11] : memref<32x128xf32, #tpu.memory_space<vmem>>, vector<32x128xf32>
    %c0_12 = arith.constant 0 : index
    %c0_13 = arith.constant 0 : index
    %13 = vector.load %arg3[%c0_12, %c0_13] : memref<8x1xi32, #tpu.memory_space<vmem>>, vector<8x1xi32>
    %c16_i32 = arith.constant 16 : i32
    %14 = arith.muli %arg1, %c16_i32 : i32
    %15 = tpu.iota {dimensions = array<i32: 1>} : vector<1x128xi32>
    %c64_i32 = arith.constant 64 : i32
    %16 = vector.broadcast %c64_i32 : i32 to vector<1x128xi32>
    %17 = arith.cmpi sge, %15, %16 : vector<1x128xi32>
    %c96_i32 = arith.constant 96 : i32
    %18 = vector.broadcast %c96_i32 : i32 to vector<1x128xi32>
    %19 = arith.cmpi slt, %15, %18 : vector<1x128xi32>
    %20 = arith.andi %17, %19 : vector<1x128xi1>
    %cst_14 = arith.constant 2.000000e+00 : f32
    %cst_15 = arith.constant 1.000000e+00 : f32
    %21 = vector.broadcast %cst_14 : f32 to vector<1x128xf32>
    %22 = vector.broadcast %cst_15 : f32 to vector<1x128xf32>
    %23 = arith.select %20, %21, %22 : vector<1x128xi1>, vector<1x128xf32>
    %c0_16 = arith.constant 0 : index
    %c0_17 = arith.constant 0 : index
    %24 = vector.load %arg10[%c0_16, %c0_17] : memref<8x32xf32, #tpu.memory_space<vmem>>, vector<8x32xf32>
    %c0_18 = arith.constant 0 : index
    %c0_19 = arith.constant 0 : index
    %25 = vector.load %arg11[%c0_18, %c0_19] : memref<8x32xf32, #tpu.memory_space<vmem>>, vector<8x32xf32>
    %c0_20 = arith.constant 0 : index
    %c0_21 = arith.constant 0 : index
    %c0_22 = arith.constant 0 : index
    %26 = vector.load %arg12[%c0_20, %c0_21, %c0_22] : memref<16x8x128xf32, #tpu.memory_space<vmem>>, vector<1x8x128xf32>
    %27 = vector.shape_cast %26 : vector<1x8x128xf32> to vector<8x128xf32>
    %cst_23 = arith.constant dense<0.000000e+00> : vector<8x128xf32>
    %28 = tpu.matmul %24, %12, %cst_23 {dimension_numbers = #tpu.dot_dimension_numbers<[1], [0], [0], [1], [0, 0, 1, 1], [], []>} : vector<8x32xf32>, vector<32x128xf32>, vector<8x128xf32> -> vector<8x128xf32>
    %29 = arith.addf %27, %28 : vector<8x128xf32>
    %30 = vector.broadcast %23 : vector<1x128xf32> to vector<8x128xf32>
    %31 = arith.mulf %29, %30 : vector<8x128xf32>
    %32 = arith.negf %31 : vector<8x128xf32>
    %33 = math.exp %32 : vector<8x128xf32>
    %cst_24 = arith.constant 1.000000e+00 : f32
    %34 = vector.broadcast %cst_24 : f32 to vector<8x128xf32>
    %35 = arith.addf %34, %33 : vector<8x128xf32>
    %36 = arith.divf %34, %35 : vector<8x128xf32>
    %37 = vector.extract_strided_slice %36 {offsets = [0, 0], sizes = [8, 32], strides = [1, 1]} : vector<8x128xf32> to vector<8x32xf32>
    %38 = vector.extract_strided_slice %36 {offsets = [0, 32], sizes = [8, 32], strides = [1, 1]} : vector<8x128xf32> to vector<8x32xf32>
    %39 = vector.extract_strided_slice %36 {offsets = [0, 64], sizes = [8, 32], strides = [1, 1]} : vector<8x128xf32> to vector<8x32xf32>
    %cst_25 = arith.constant 2.000000e+00 : f32
    %40 = vector.broadcast %cst_25 : f32 to vector<8x32xf32>
    %41 = arith.mulf %40, %39 : vector<8x32xf32>
    %cst_26 = arith.constant 1.000000e+00 : f32
    %42 = vector.broadcast %cst_26 : f32 to vector<8x32xf32>
    %43 = arith.subf %41, %42 : vector<8x32xf32>
    %44 = vector.extract_strided_slice %36 {offsets = [0, 96], sizes = [8, 32], strides = [1, 1]} : vector<8x128xf32> to vector<8x32xf32>
    %45 = arith.mulf %38, %25 : vector<8x32xf32>
    %46 = arith.mulf %37, %43 : vector<8x32xf32>
    %47 = arith.addf %45, %46 : vector<8x32xf32>
    %48 = math.tanh %47 : vector<8x32xf32>
    %49 = arith.mulf %44, %48 : vector<8x32xf32>
    %c0_i32_27 = arith.constant 0 : i32
    %50 = arith.addi %14, %c0_i32_27 : i32
    %51 = vector.broadcast %50 : i32 to vector<8x1xi32>
    %52 = arith.cmpi slt, %51, %13 : vector<8x1xi32>
    %53 = vector.shape_cast %52 : vector<8x1xi1> to vector<8x1xi1>
    %54 = vector.broadcast %53 : vector<8x1xi1> to vector<8x32xi1>
    %55 = arith.select %54, %47, %25 : vector<8x32xi1>, vector<8x32xf32>
    %56 = vector.shape_cast %52 : vector<8x1xi1> to vector<8x1xi1>
    %57 = vector.broadcast %56 : vector<8x1xi1> to vector<8x32xi1>
    %58 = arith.select %57, %49, %24 : vector<8x32xi1>, vector<8x32xf32>
    %c1 = arith.constant 1 : index
    %c0_28 = arith.constant 0 : index
    %c0_29 = arith.constant 0 : index
    %59 = vector.load %arg12[%c1, %c0_28, %c0_29] : memref<16x8x128xf32, #tpu.memory_space<vmem>>, vector<1x8x128xf32>
    %60 = vector.shape_cast %59 : vector<1x8x128xf32> to vector<8x128xf32>
    %cst_30 = arith.constant dense<0.000000e+00> : vector<8x128xf32>
    %61 = tpu.matmul %58, %12, %cst_30 {dimension_numbers = #tpu.dot_dimension_numbers<[1], [0], [0], [1], [0, 0, 1, 1], [], []>} : vector<8x32xf32>, vector<32x128xf32>, vector<8x128xf32> -> vector<8x128xf32>
    %62 = arith.addf %60, %61 : vector<8x128xf32>
    %63 = vector.broadcast %23 : vector<1x128xf32> to vector<8x128xf32>
    %64 = arith.mulf %62, %63 : vector<8x128xf32>
    %65 = arith.negf %64 : vector<8x128xf32>
    %66 = math.exp %65 : vector<8x128xf32>
    %cst_31 = arith.constant 1.000000e+00 : f32
    %67 = vector.broadcast %cst_31 : f32 to vector<8x128xf32>
    %68 = arith.addf %67, %66 : vector<8x128xf32>
    %69 = arith.divf %67, %68 : vector<8x128xf32>
    %70 = vector.extract_strided_slice %69 {offsets = [0, 0], sizes = [8, 32], strides = [1, 1]} : vector<8x128xf32> to vector<8x32xf32>
    %71 = vector.extract_strided_slice %69 {offsets = [0, 32], sizes = [8, 32], strides = [1, 1]} : vector<8x128xf32> to vector<8x32xf32>
    %72 = vector.extract_strided_slice %69 {offsets = [0, 64], sizes = [8, 32], strides = [1, 1]} : vector<8x128xf32> to vector<8x32xf32>
    %cst_32 = arith.constant 2.000000e+00 : f32
    %73 = vector.broadcast %cst_32 : f32 to vector<8x32xf32>
    %74 = arith.mulf %73, %72 : vector<8x32xf32>
    %cst_33 = arith.constant 1.000000e+00 : f32
    %75 = vector.broadcast %cst_33 : f32 to vector<8x32xf32>
    %76 = arith.subf %74, %75 : vector<8x32xf32>
    %77 = vector.extract_strided_slice %69 {offsets = [0, 96], sizes = [8, 32], strides = [1, 1]} : vector<8x128xf32> to vector<8x32xf32>
    %78 = arith.mulf %71, %55 : vector<8x32xf32>
    %79 = arith.mulf %70, %76 : vector<8x32xf32>
    %80 = arith.addf %78, %79 : vector<8x32xf32>
    %81 = math.tanh %80 : vector<8x32xf32>
    %82 = arith.mulf %77, %81 : vector<8x32xf32>
    %c1_i32 = arith.constant 1 : i32
    %83 = arith.addi %14, %c1_i32 : i32
    %84 = vector.broadcast %83 : i32 to vector<8x1xi32>
    %85 = arith.cmpi slt, %84, %13 : vector<8x1xi32>
    %86 = vector.shape_cast %85 : vector<8x1xi1> to vector<8x1xi1>
    %87 = vector.broadcast %86 : vector<8x1xi1> to vector<8x32xi1>
    %88 = arith.select %87, %80, %55 : vector<8x32xi1>, vector<8x32xf32>
    %89 = vector.shape_cast %85 : vector<8x1xi1> to vector<8x1xi1>
    %90 = vector.broadcast %89 : vector<8x1xi1> to vector<8x32xi1>
    %91 = arith.select %90, %82, %58 : vector<8x32xi1>, vector<8x32xf32>
    %c2 = arith.constant 2 : index
    %c0_34 = arith.constant 0 : index
    %c0_35 = arith.constant 0 : index
    %92 = vector.load %arg12[%c2, %c0_34, %c0_35] : memref<16x8x128xf32, #tpu.memory_space<vmem>>, vector<1x8x128xf32>
    %93 = vector.shape_cast %92 : vector<1x8x128xf32> to vector<8x128xf32>
    %cst_36 = arith.constant dense<0.000000e+00> : vector<8x128xf32>
    %94 = tpu.matmul %91, %12, %cst_36 {dimension_numbers = #tpu.dot_dimension_numbers<[1], [0], [0], [1], [0, 0, 1, 1], [], []>} : vector<8x32xf32>, vector<32x128xf32>, vector<8x128xf32> -> vector<8x128xf32>
    %95 = arith.addf %93, %94 : vector<8x128xf32>
    %96 = vector.broadcast %23 : vector<1x128xf32> to vector<8x128xf32>
    %97 = arith.mulf %95, %96 : vector<8x128xf32>
    %98 = arith.negf %97 : vector<8x128xf32>
    %99 = math.exp %98 : vector<8x128xf32>
    %cst_37 = arith.constant 1.000000e+00 : f32
    %100 = vector.broadcast %cst_37 : f32 to vector<8x128xf32>
    %101 = arith.addf %100, %99 : vector<8x128xf32>
    %102 = arith.divf %100, %101 : vector<8x128xf32>
    %103 = vector.extract_strided_slice %102 {offsets = [0, 0], sizes = [8, 32], strides = [1, 1]} : vector<8x128xf32> to vector<8x32xf32>
    %104 = vector.extract_strided_slice %102 {offsets = [0, 32], sizes = [8, 32], strides = [1, 1]} : vector<8x128xf32> to vector<8x32xf32>
    %105 = vector.extract_strided_slice %102 {offsets = [0, 64], sizes = [8, 32], strides = [1, 1]} : vector<8x128xf32> to vector<8x32xf32>
    %cst_38 = arith.constant 2.000000e+00 : f32
    %106 = vector.broadcast %cst_38 : f32 to vector<8x32xf32>
    %107 = arith.mulf %106, %105 : vector<8x32xf32>
    %cst_39 = arith.constant 1.000000e+00 : f32
    %108 = vector.broadcast %cst_39 : f32 to vector<8x32xf32>
    %109 = arith.subf %107, %108 : vector<8x32xf32>
    %110 = vector.extract_strided_slice %102 {offsets = [0, 96], sizes = [8, 32], strides = [1, 1]} : vector<8x128xf32> to vector<8x32xf32>
    %111 = arith.mulf %104, %88 : vector<8x32xf32>
    %112 = arith.mulf %103, %109 : vector<8x32xf32>
    %113 = arith.addf %111, %112 : vector<8x32xf32>
    %114 = math.tanh %113 : vector<8x32xf32>
    %115 = arith.mulf %110, %114 : vector<8x32xf32>
    %c2_i32 = arith.constant 2 : i32
    %116 = arith.addi %14, %c2_i32 : i32
    %117 = vector.broadcast %116 : i32 to vector<8x1xi32>
    %118 = arith.cmpi slt, %117, %13 : vector<8x1xi32>
    %119 = vector.shape_cast %118 : vector<8x1xi1> to vector<8x1xi1>
    %120 = vector.broadcast %119 : vector<8x1xi1> to vector<8x32xi1>
    %121 = arith.select %120, %113, %88 : vector<8x32xi1>, vector<8x32xf32>
    %122 = vector.shape_cast %118 : vector<8x1xi1> to vector<8x1xi1>
    %123 = vector.broadcast %122 : vector<8x1xi1> to vector<8x32xi1>
    %124 = arith.select %123, %115, %91 : vector<8x32xi1>, vector<8x32xf32>
    %c3 = arith.constant 3 : index
    %c0_40 = arith.constant 0 : index
    %c0_41 = arith.constant 0 : index
    %125 = vector.load %arg12[%c3, %c0_40, %c0_41] : memref<16x8x128xf32, #tpu.memory_space<vmem>>, vector<1x8x128xf32>
    %126 = vector.shape_cast %125 : vector<1x8x128xf32> to vector<8x128xf32>
    %cst_42 = arith.constant dense<0.000000e+00> : vector<8x128xf32>
    %127 = tpu.matmul %124, %12, %cst_42 {dimension_numbers = #tpu.dot_dimension_numbers<[1], [0], [0], [1], [0, 0, 1, 1], [], []>} : vector<8x32xf32>, vector<32x128xf32>, vector<8x128xf32> -> vector<8x128xf32>
    %128 = arith.addf %126, %127 : vector<8x128xf32>
    %129 = vector.broadcast %23 : vector<1x128xf32> to vector<8x128xf32>
    %130 = arith.mulf %128, %129 : vector<8x128xf32>
    %131 = arith.negf %130 : vector<8x128xf32>
    %132 = math.exp %131 : vector<8x128xf32>
    %cst_43 = arith.constant 1.000000e+00 : f32
    %133 = vector.broadcast %cst_43 : f32 to vector<8x128xf32>
    %134 = arith.addf %133, %132 : vector<8x128xf32>
    %135 = arith.divf %133, %134 : vector<8x128xf32>
    %136 = vector.extract_strided_slice %135 {offsets = [0, 0], sizes = [8, 32], strides = [1, 1]} : vector<8x128xf32> to vector<8x32xf32>
    %137 = vector.extract_strided_slice %135 {offsets = [0, 32], sizes = [8, 32], strides = [1, 1]} : vector<8x128xf32> to vector<8x32xf32>
    %138 = vector.extract_strided_slice %135 {offsets = [0, 64], sizes = [8, 32], strides = [1, 1]} : vector<8x128xf32> to vector<8x32xf32>
    %cst_44 = arith.constant 2.000000e+00 : f32
    %139 = vector.broadcast %cst_44 : f32 to vector<8x32xf32>
    %140 = arith.mulf %139, %138 : vector<8x32xf32>
    %cst_45 = arith.constant 1.000000e+00 : f32
    %141 = vector.broadcast %cst_45 : f32 to vector<8x32xf32>
    %142 = arith.subf %140, %141 : vector<8x32xf32>
    %143 = vector.extract_strided_slice %135 {offsets = [0, 96], sizes = [8, 32], strides = [1, 1]} : vector<8x128xf32> to vector<8x32xf32>
    %144 = arith.mulf %137, %121 : vector<8x32xf32>
    %145 = arith.mulf %136, %142 : vector<8x32xf32>
    %146 = arith.addf %144, %145 : vector<8x32xf32>
    %147 = math.tanh %146 : vector<8x32xf32>
    %148 = arith.mulf %143, %147 : vector<8x32xf32>
    %c3_i32 = arith.constant 3 : i32
    %149 = arith.addi %14, %c3_i32 : i32
    %150 = vector.broadcast %149 : i32 to vector<8x1xi32>
    %151 = arith.cmpi slt, %150, %13 : vector<8x1xi32>
    %152 = vector.shape_cast %151 : vector<8x1xi1> to vector<8x1xi1>
    %153 = vector.broadcast %152 : vector<8x1xi1> to vector<8x32xi1>
    %154 = arith.select %153, %146, %121 : vector<8x32xi1>, vector<8x32xf32>
    %155 = vector.shape_cast %151 : vector<8x1xi1> to vector<8x1xi1>
    %156 = vector.broadcast %155 : vector<8x1xi1> to vector<8x32xi1>
    %157 = arith.select %156, %148, %124 : vector<8x32xi1>, vector<8x32xf32>
    %c4 = arith.constant 4 : index
    %c0_46 = arith.constant 0 : index
    %c0_47 = arith.constant 0 : index
    %158 = vector.load %arg12[%c4, %c0_46, %c0_47] : memref<16x8x128xf32, #tpu.memory_space<vmem>>, vector<1x8x128xf32>
    %159 = vector.shape_cast %158 : vector<1x8x128xf32> to vector<8x128xf32>
    %cst_48 = arith.constant dense<0.000000e+00> : vector<8x128xf32>
    %160 = tpu.matmul %157, %12, %cst_48 {dimension_numbers = #tpu.dot_dimension_numbers<[1], [0], [0], [1], [0, 0, 1, 1], [], []>} : vector<8x32xf32>, vector<32x128xf32>, vector<8x128xf32> -> vector<8x128xf32>
    %161 = arith.addf %159, %160 : vector<8x128xf32>
    %162 = vector.broadcast %23 : vector<1x128xf32> to vector<8x128xf32>
    %163 = arith.mulf %161, %162 : vector<8x128xf32>
    %164 = arith.negf %163 : vector<8x128xf32>
    %165 = math.exp %164 : vector<8x128xf32>
    %cst_49 = arith.constant 1.000000e+00 : f32
    %166 = vector.broadcast %cst_49 : f32 to vector<8x128xf32>
    %167 = arith.addf %166, %165 : vector<8x128xf32>
    %168 = arith.divf %166, %167 : vector<8x128xf32>
    %169 = vector.extract_strided_slice %168 {offsets = [0, 0], sizes = [8, 32], strides = [1, 1]} : vector<8x128xf32> to vector<8x32xf32>
    %170 = vector.extract_strided_slice %168 {offsets = [0, 32], sizes = [8, 32], strides = [1, 1]} : vector<8x128xf32> to vector<8x32xf32>
    %171 = vector.extract_strided_slice %168 {offsets = [0, 64], sizes = [8, 32], strides = [1, 1]} : vector<8x128xf32> to vector<8x32xf32>
    %cst_50 = arith.constant 2.000000e+00 : f32
    %172 = vector.broadcast %cst_50 : f32 to vector<8x32xf32>
    %173 = arith.mulf %172, %171 : vector<8x32xf32>
    %cst_51 = arith.constant 1.000000e+00 : f32
    %174 = vector.broadcast %cst_51 : f32 to vector<8x32xf32>
    %175 = arith.subf %173, %174 : vector<8x32xf32>
    %176 = vector.extract_strided_slice %168 {offsets = [0, 96], sizes = [8, 32], strides = [1, 1]} : vector<8x128xf32> to vector<8x32xf32>
    %177 = arith.mulf %170, %154 : vector<8x32xf32>
    %178 = arith.mulf %169, %175 : vector<8x32xf32>
    %179 = arith.addf %177, %178 : vector<8x32xf32>
    %180 = math.tanh %179 : vector<8x32xf32>
    %181 = arith.mulf %176, %180 : vector<8x32xf32>
    %c4_i32 = arith.constant 4 : i32
    %182 = arith.addi %14, %c4_i32 : i32
    %183 = vector.broadcast %182 : i32 to vector<8x1xi32>
    %184 = arith.cmpi slt, %183, %13 : vector<8x1xi32>
    %185 = vector.shape_cast %184 : vector<8x1xi1> to vector<8x1xi1>
    %186 = vector.broadcast %185 : vector<8x1xi1> to vector<8x32xi1>
    %187 = arith.select %186, %179, %154 : vector<8x32xi1>, vector<8x32xf32>
    %188 = vector.shape_cast %184 : vector<8x1xi1> to vector<8x1xi1>
    %189 = vector.broadcast %188 : vector<8x1xi1> to vector<8x32xi1>
    %190 = arith.select %189, %181, %157 : vector<8x32xi1>, vector<8x32xf32>
    %c5 = arith.constant 5 : index
    %c0_52 = arith.constant 0 : index
    %c0_53 = arith.constant 0 : index
    %191 = vector.load %arg12[%c5, %c0_52, %c0_53] : memref<16x8x128xf32, #tpu.memory_space<vmem>>, vector<1x8x128xf32>
    %192 = vector.shape_cast %191 : vector<1x8x128xf32> to vector<8x128xf32>
    %cst_54 = arith.constant dense<0.000000e+00> : vector<8x128xf32>
    %193 = tpu.matmul %190, %12, %cst_54 {dimension_numbers = #tpu.dot_dimension_numbers<[1], [0], [0], [1], [0, 0, 1, 1], [], []>} : vector<8x32xf32>, vector<32x128xf32>, vector<8x128xf32> -> vector<8x128xf32>
    %194 = arith.addf %192, %193 : vector<8x128xf32>
    %195 = vector.broadcast %23 : vector<1x128xf32> to vector<8x128xf32>
    %196 = arith.mulf %194, %195 : vector<8x128xf32>
    %197 = arith.negf %196 : vector<8x128xf32>
    %198 = math.exp %197 : vector<8x128xf32>
    %cst_55 = arith.constant 1.000000e+00 : f32
    %199 = vector.broadcast %cst_55 : f32 to vector<8x128xf32>
    %200 = arith.addf %199, %198 : vector<8x128xf32>
    %201 = arith.divf %199, %200 : vector<8x128xf32>
    %202 = vector.extract_strided_slice %201 {offsets = [0, 0], sizes = [8, 32], strides = [1, 1]} : vector<8x128xf32> to vector<8x32xf32>
    %203 = vector.extract_strided_slice %201 {offsets = [0, 32], sizes = [8, 32], strides = [1, 1]} : vector<8x128xf32> to vector<8x32xf32>
    %204 = vector.extract_strided_slice %201 {offsets = [0, 64], sizes = [8, 32], strides = [1, 1]} : vector<8x128xf32> to vector<8x32xf32>
    %cst_56 = arith.constant 2.000000e+00 : f32
    %205 = vector.broadcast %cst_56 : f32 to vector<8x32xf32>
    %206 = arith.mulf %205, %204 : vector<8x32xf32>
    %cst_57 = arith.constant 1.000000e+00 : f32
    %207 = vector.broadcast %cst_57 : f32 to vector<8x32xf32>
    %208 = arith.subf %206, %207 : vector<8x32xf32>
    %209 = vector.extract_strided_slice %201 {offsets = [0, 96], sizes = [8, 32], strides = [1, 1]} : vector<8x128xf32> to vector<8x32xf32>
    %210 = arith.mulf %203, %187 : vector<8x32xf32>
    %211 = arith.mulf %202, %208 : vector<8x32xf32>
    %212 = arith.addf %210, %211 : vector<8x32xf32>
    %213 = math.tanh %212 : vector<8x32xf32>
    %214 = arith.mulf %209, %213 : vector<8x32xf32>
    %c5_i32 = arith.constant 5 : i32
    %215 = arith.addi %14, %c5_i32 : i32
    %216 = vector.broadcast %215 : i32 to vector<8x1xi32>
    %217 = arith.cmpi slt, %216, %13 : vector<8x1xi32>
    %218 = vector.shape_cast %217 : vector<8x1xi1> to vector<8x1xi1>
    %219 = vector.broadcast %218 : vector<8x1xi1> to vector<8x32xi1>
    %220 = arith.select %219, %212, %187 : vector<8x32xi1>, vector<8x32xf32>
    %221 = vector.shape_cast %217 : vector<8x1xi1> to vector<8x1xi1>
    %222 = vector.broadcast %221 : vector<8x1xi1> to vector<8x32xi1>
    %223 = arith.select %222, %214, %190 : vector<8x32xi1>, vector<8x32xf32>
    %c6 = arith.constant 6 : index
    %c0_58 = arith.constant 0 : index
    %c0_59 = arith.constant 0 : index
    %224 = vector.load %arg12[%c6, %c0_58, %c0_59] : memref<16x8x128xf32, #tpu.memory_space<vmem>>, vector<1x8x128xf32>
    %225 = vector.shape_cast %224 : vector<1x8x128xf32> to vector<8x128xf32>
    %cst_60 = arith.constant dense<0.000000e+00> : vector<8x128xf32>
    %226 = tpu.matmul %223, %12, %cst_60 {dimension_numbers = #tpu.dot_dimension_numbers<[1], [0], [0], [1], [0, 0, 1, 1], [], []>} : vector<8x32xf32>, vector<32x128xf32>, vector<8x128xf32> -> vector<8x128xf32>
    %227 = arith.addf %225, %226 : vector<8x128xf32>
    %228 = vector.broadcast %23 : vector<1x128xf32> to vector<8x128xf32>
    %229 = arith.mulf %227, %228 : vector<8x128xf32>
    %230 = arith.negf %229 : vector<8x128xf32>
    %231 = math.exp %230 : vector<8x128xf32>
    %cst_61 = arith.constant 1.000000e+00 : f32
    %232 = vector.broadcast %cst_61 : f32 to vector<8x128xf32>
    %233 = arith.addf %232, %231 : vector<8x128xf32>
    %234 = arith.divf %232, %233 : vector<8x128xf32>
    %235 = vector.extract_strided_slice %234 {offsets = [0, 0], sizes = [8, 32], strides = [1, 1]} : vector<8x128xf32> to vector<8x32xf32>
    %236 = vector.extract_strided_slice %234 {offsets = [0, 32], sizes = [8, 32], strides = [1, 1]} : vector<8x128xf32> to vector<8x32xf32>
    %237 = vector.extract_strided_slice %234 {offsets = [0, 64], sizes = [8, 32], strides = [1, 1]} : vector<8x128xf32> to vector<8x32xf32>
    %cst_62 = arith.constant 2.000000e+00 : f32
    %238 = vector.broadcast %cst_62 : f32 to vector<8x32xf32>
    %239 = arith.mulf %238, %237 : vector<8x32xf32>
    %cst_63 = arith.constant 1.000000e+00 : f32
    %240 = vector.broadcast %cst_63 : f32 to vector<8x32xf32>
    %241 = arith.subf %239, %240 : vector<8x32xf32>
    %242 = vector.extract_strided_slice %234 {offsets = [0, 96], sizes = [8, 32], strides = [1, 1]} : vector<8x128xf32> to vector<8x32xf32>
    %243 = arith.mulf %236, %220 : vector<8x32xf32>
    %244 = arith.mulf %235, %241 : vector<8x32xf32>
    %245 = arith.addf %243, %244 : vector<8x32xf32>
    %246 = math.tanh %245 : vector<8x32xf32>
    %247 = arith.mulf %242, %246 : vector<8x32xf32>
    %c6_i32 = arith.constant 6 : i32
    %248 = arith.addi %14, %c6_i32 : i32
    %249 = vector.broadcast %248 : i32 to vector<8x1xi32>
    %250 = arith.cmpi slt, %249, %13 : vector<8x1xi32>
    %251 = vector.shape_cast %250 : vector<8x1xi1> to vector<8x1xi1>
    %252 = vector.broadcast %251 : vector<8x1xi1> to vector<8x32xi1>
    %253 = arith.select %252, %245, %220 : vector<8x32xi1>, vector<8x32xf32>
    %254 = vector.shape_cast %250 : vector<8x1xi1> to vector<8x1xi1>
    %255 = vector.broadcast %254 : vector<8x1xi1> to vector<8x32xi1>
    %256 = arith.select %255, %247, %223 : vector<8x32xi1>, vector<8x32xf32>
    %c7 = arith.constant 7 : index
    %c0_64 = arith.constant 0 : index
    %c0_65 = arith.constant 0 : index
    %257 = vector.load %arg12[%c7, %c0_64, %c0_65] : memref<16x8x128xf32, #tpu.memory_space<vmem>>, vector<1x8x128xf32>
    %258 = vector.shape_cast %257 : vector<1x8x128xf32> to vector<8x128xf32>
    %cst_66 = arith.constant dense<0.000000e+00> : vector<8x128xf32>
    %259 = tpu.matmul %256, %12, %cst_66 {dimension_numbers = #tpu.dot_dimension_numbers<[1], [0], [0], [1], [0, 0, 1, 1], [], []>} : vector<8x32xf32>, vector<32x128xf32>, vector<8x128xf32> -> vector<8x128xf32>
    %260 = arith.addf %258, %259 : vector<8x128xf32>
    %261 = vector.broadcast %23 : vector<1x128xf32> to vector<8x128xf32>
    %262 = arith.mulf %260, %261 : vector<8x128xf32>
    %263 = arith.negf %262 : vector<8x128xf32>
    %264 = math.exp %263 : vector<8x128xf32>
    %cst_67 = arith.constant 1.000000e+00 : f32
    %265 = vector.broadcast %cst_67 : f32 to vector<8x128xf32>
    %266 = arith.addf %265, %264 : vector<8x128xf32>
    %267 = arith.divf %265, %266 : vector<8x128xf32>
    %268 = vector.extract_strided_slice %267 {offsets = [0, 0], sizes = [8, 32], strides = [1, 1]} : vector<8x128xf32> to vector<8x32xf32>
    %269 = vector.extract_strided_slice %267 {offsets = [0, 32], sizes = [8, 32], strides = [1, 1]} : vector<8x128xf32> to vector<8x32xf32>
    %270 = vector.extract_strided_slice %267 {offsets = [0, 64], sizes = [8, 32], strides = [1, 1]} : vector<8x128xf32> to vector<8x32xf32>
    %cst_68 = arith.constant 2.000000e+00 : f32
    %271 = vector.broadcast %cst_68 : f32 to vector<8x32xf32>
    %272 = arith.mulf %271, %270 : vector<8x32xf32>
    %cst_69 = arith.constant 1.000000e+00 : f32
    %273 = vector.broadcast %cst_69 : f32 to vector<8x32xf32>
    %274 = arith.subf %272, %273 : vector<8x32xf32>
    %275 = vector.extract_strided_slice %267 {offsets = [0, 96], sizes = [8, 32], strides = [1, 1]} : vector<8x128xf32> to vector<8x32xf32>
    %276 = arith.mulf %269, %253 : vector<8x32xf32>
    %277 = arith.mulf %268, %274 : vector<8x32xf32>
    %278 = arith.addf %276, %277 : vector<8x32xf32>
    %279 = math.tanh %278 : vector<8x32xf32>
    %280 = arith.mulf %275, %279 : vector<8x32xf32>
    %c7_i32 = arith.constant 7 : i32
    %281 = arith.addi %14, %c7_i32 : i32
    %282 = vector.broadcast %281 : i32 to vector<8x1xi32>
    %283 = arith.cmpi slt, %282, %13 : vector<8x1xi32>
    %284 = vector.shape_cast %283 : vector<8x1xi1> to vector<8x1xi1>
    %285 = vector.broadcast %284 : vector<8x1xi1> to vector<8x32xi1>
    %286 = arith.select %285, %278, %253 : vector<8x32xi1>, vector<8x32xf32>
    %287 = vector.shape_cast %283 : vector<8x1xi1> to vector<8x1xi1>
    %288 = vector.broadcast %287 : vector<8x1xi1> to vector<8x32xi1>
    %289 = arith.select %288, %280, %256 : vector<8x32xi1>, vector<8x32xf32>
    %c8 = arith.constant 8 : index
    %c0_70 = arith.constant 0 : index
    %c0_71 = arith.constant 0 : index
    %290 = vector.load %arg12[%c8, %c0_70, %c0_71] : memref<16x8x128xf32, #tpu.memory_space<vmem>>, vector<1x8x128xf32>
    %291 = vector.shape_cast %290 : vector<1x8x128xf32> to vector<8x128xf32>
    %cst_72 = arith.constant dense<0.000000e+00> : vector<8x128xf32>
    %292 = tpu.matmul %289, %12, %cst_72 {dimension_numbers = #tpu.dot_dimension_numbers<[1], [0], [0], [1], [0, 0, 1, 1], [], []>} : vector<8x32xf32>, vector<32x128xf32>, vector<8x128xf32> -> vector<8x128xf32>
    %293 = arith.addf %291, %292 : vector<8x128xf32>
    %294 = vector.broadcast %23 : vector<1x128xf32> to vector<8x128xf32>
    %295 = arith.mulf %293, %294 : vector<8x128xf32>
    %296 = arith.negf %295 : vector<8x128xf32>
    %297 = math.exp %296 : vector<8x128xf32>
    %cst_73 = arith.constant 1.000000e+00 : f32
    %298 = vector.broadcast %cst_73 : f32 to vector<8x128xf32>
    %299 = arith.addf %298, %297 : vector<8x128xf32>
    %300 = arith.divf %298, %299 : vector<8x128xf32>
    %301 = vector.extract_strided_slice %300 {offsets = [0, 0], sizes = [8, 32], strides = [1, 1]} : vector<8x128xf32> to vector<8x32xf32>
    %302 = vector.extract_strided_slice %300 {offsets = [0, 32], sizes = [8, 32], strides = [1, 1]} : vector<8x128xf32> to vector<8x32xf32>
    %303 = vector.extract_strided_slice %300 {offsets = [0, 64], sizes = [8, 32], strides = [1, 1]} : vector<8x128xf32> to vector<8x32xf32>
    %cst_74 = arith.constant 2.000000e+00 : f32
    %304 = vector.broadcast %cst_74 : f32 to vector<8x32xf32>
    %305 = arith.mulf %304, %303 : vector<8x32xf32>
    %cst_75 = arith.constant 1.000000e+00 : f32
    %306 = vector.broadcast %cst_75 : f32 to vector<8x32xf32>
    %307 = arith.subf %305, %306 : vector<8x32xf32>
    %308 = vector.extract_strided_slice %300 {offsets = [0, 96], sizes = [8, 32], strides = [1, 1]} : vector<8x128xf32> to vector<8x32xf32>
    %309 = arith.mulf %302, %286 : vector<8x32xf32>
    %310 = arith.mulf %301, %307 : vector<8x32xf32>
    %311 = arith.addf %309, %310 : vector<8x32xf32>
    %312 = math.tanh %311 : vector<8x32xf32>
    %313 = arith.mulf %308, %312 : vector<8x32xf32>
    %c8_i32 = arith.constant 8 : i32
    %314 = arith.addi %14, %c8_i32 : i32
    %315 = vector.broadcast %314 : i32 to vector<8x1xi32>
    %316 = arith.cmpi slt, %315, %13 : vector<8x1xi32>
    %317 = vector.shape_cast %316 : vector<8x1xi1> to vector<8x1xi1>
    %318 = vector.broadcast %317 : vector<8x1xi1> to vector<8x32xi1>
    %319 = arith.select %318, %311, %286 : vector<8x32xi1>, vector<8x32xf32>
    %320 = vector.shape_cast %316 : vector<8x1xi1> to vector<8x1xi1>
    %321 = vector.broadcast %320 : vector<8x1xi1> to vector<8x32xi1>
    %322 = arith.select %321, %313, %289 : vector<8x32xi1>, vector<8x32xf32>
    %c9 = arith.constant 9 : index
    %c0_76 = arith.constant 0 : index
    %c0_77 = arith.constant 0 : index
    %323 = vector.load %arg12[%c9, %c0_76, %c0_77] : memref<16x8x128xf32, #tpu.memory_space<vmem>>, vector<1x8x128xf32>
    %324 = vector.shape_cast %323 : vector<1x8x128xf32> to vector<8x128xf32>
    %cst_78 = arith.constant dense<0.000000e+00> : vector<8x128xf32>
    %325 = tpu.matmul %322, %12, %cst_78 {dimension_numbers = #tpu.dot_dimension_numbers<[1], [0], [0], [1], [0, 0, 1, 1], [], []>} : vector<8x32xf32>, vector<32x128xf32>, vector<8x128xf32> -> vector<8x128xf32>
    %326 = arith.addf %324, %325 : vector<8x128xf32>
    %327 = vector.broadcast %23 : vector<1x128xf32> to vector<8x128xf32>
    %328 = arith.mulf %326, %327 : vector<8x128xf32>
    %329 = arith.negf %328 : vector<8x128xf32>
    %330 = math.exp %329 : vector<8x128xf32>
    %cst_79 = arith.constant 1.000000e+00 : f32
    %331 = vector.broadcast %cst_79 : f32 to vector<8x128xf32>
    %332 = arith.addf %331, %330 : vector<8x128xf32>
    %333 = arith.divf %331, %332 : vector<8x128xf32>
    %334 = vector.extract_strided_slice %333 {offsets = [0, 0], sizes = [8, 32], strides = [1, 1]} : vector<8x128xf32> to vector<8x32xf32>
    %335 = vector.extract_strided_slice %333 {offsets = [0, 32], sizes = [8, 32], strides = [1, 1]} : vector<8x128xf32> to vector<8x32xf32>
    %336 = vector.extract_strided_slice %333 {offsets = [0, 64], sizes = [8, 32], strides = [1, 1]} : vector<8x128xf32> to vector<8x32xf32>
    %cst_80 = arith.constant 2.000000e+00 : f32
    %337 = vector.broadcast %cst_80 : f32 to vector<8x32xf32>
    %338 = arith.mulf %337, %336 : vector<8x32xf32>
    %cst_81 = arith.constant 1.000000e+00 : f32
    %339 = vector.broadcast %cst_81 : f32 to vector<8x32xf32>
    %340 = arith.subf %338, %339 : vector<8x32xf32>
    %341 = vector.extract_strided_slice %333 {offsets = [0, 96], sizes = [8, 32], strides = [1, 1]} : vector<8x128xf32> to vector<8x32xf32>
    %342 = arith.mulf %335, %319 : vector<8x32xf32>
    %343 = arith.mulf %334, %340 : vector<8x32xf32>
    %344 = arith.addf %342, %343 : vector<8x32xf32>
    %345 = math.tanh %344 : vector<8x32xf32>
    %346 = arith.mulf %341, %345 : vector<8x32xf32>
    %c9_i32 = arith.constant 9 : i32
    %347 = arith.addi %14, %c9_i32 : i32
    %348 = vector.broadcast %347 : i32 to vector<8x1xi32>
    %349 = arith.cmpi slt, %348, %13 : vector<8x1xi32>
    %350 = vector.shape_cast %349 : vector<8x1xi1> to vector<8x1xi1>
    %351 = vector.broadcast %350 : vector<8x1xi1> to vector<8x32xi1>
    %352 = arith.select %351, %344, %319 : vector<8x32xi1>, vector<8x32xf32>
    %353 = vector.shape_cast %349 : vector<8x1xi1> to vector<8x1xi1>
    %354 = vector.broadcast %353 : vector<8x1xi1> to vector<8x32xi1>
    %355 = arith.select %354, %346, %322 : vector<8x32xi1>, vector<8x32xf32>
    %c10 = arith.constant 10 : index
    %c0_82 = arith.constant 0 : index
    %c0_83 = arith.constant 0 : index
    %356 = vector.load %arg12[%c10, %c0_82, %c0_83] : memref<16x8x128xf32, #tpu.memory_space<vmem>>, vector<1x8x128xf32>
    %357 = vector.shape_cast %356 : vector<1x8x128xf32> to vector<8x128xf32>
    %cst_84 = arith.constant dense<0.000000e+00> : vector<8x128xf32>
    %358 = tpu.matmul %355, %12, %cst_84 {dimension_numbers = #tpu.dot_dimension_numbers<[1], [0], [0], [1], [0, 0, 1, 1], [], []>} : vector<8x32xf32>, vector<32x128xf32>, vector<8x128xf32> -> vector<8x128xf32>
    %359 = arith.addf %357, %358 : vector<8x128xf32>
    %360 = vector.broadcast %23 : vector<1x128xf32> to vector<8x128xf32>
    %361 = arith.mulf %359, %360 : vector<8x128xf32>
    %362 = arith.negf %361 : vector<8x128xf32>
    %363 = math.exp %362 : vector<8x128xf32>
    %cst_85 = arith.constant 1.000000e+00 : f32
    %364 = vector.broadcast %cst_85 : f32 to vector<8x128xf32>
    %365 = arith.addf %364, %363 : vector<8x128xf32>
    %366 = arith.divf %364, %365 : vector<8x128xf32>
    %367 = vector.extract_strided_slice %366 {offsets = [0, 0], sizes = [8, 32], strides = [1, 1]} : vector<8x128xf32> to vector<8x32xf32>
    %368 = vector.extract_strided_slice %366 {offsets = [0, 32], sizes = [8, 32], strides = [1, 1]} : vector<8x128xf32> to vector<8x32xf32>
    %369 = vector.extract_strided_slice %366 {offsets = [0, 64], sizes = [8, 32], strides = [1, 1]} : vector<8x128xf32> to vector<8x32xf32>
    %cst_86 = arith.constant 2.000000e+00 : f32
    %370 = vector.broadcast %cst_86 : f32 to vector<8x32xf32>
    %371 = arith.mulf %370, %369 : vector<8x32xf32>
    %cst_87 = arith.constant 1.000000e+00 : f32
    %372 = vector.broadcast %cst_87 : f32 to vector<8x32xf32>
    %373 = arith.subf %371, %372 : vector<8x32xf32>
    %374 = vector.extract_strided_slice %366 {offsets = [0, 96], sizes = [8, 32], strides = [1, 1]} : vector<8x128xf32> to vector<8x32xf32>
    %375 = arith.mulf %368, %352 : vector<8x32xf32>
    %376 = arith.mulf %367, %373 : vector<8x32xf32>
    %377 = arith.addf %375, %376 : vector<8x32xf32>
    %378 = math.tanh %377 : vector<8x32xf32>
    %379 = arith.mulf %374, %378 : vector<8x32xf32>
    %c10_i32 = arith.constant 10 : i32
    %380 = arith.addi %14, %c10_i32 : i32
    %381 = vector.broadcast %380 : i32 to vector<8x1xi32>
    %382 = arith.cmpi slt, %381, %13 : vector<8x1xi32>
    %383 = vector.shape_cast %382 : vector<8x1xi1> to vector<8x1xi1>
    %384 = vector.broadcast %383 : vector<8x1xi1> to vector<8x32xi1>
    %385 = arith.select %384, %377, %352 : vector<8x32xi1>, vector<8x32xf32>
    %386 = vector.shape_cast %382 : vector<8x1xi1> to vector<8x1xi1>
    %387 = vector.broadcast %386 : vector<8x1xi1> to vector<8x32xi1>
    %388 = arith.select %387, %379, %355 : vector<8x32xi1>, vector<8x32xf32>
    %c11 = arith.constant 11 : index
    %c0_88 = arith.constant 0 : index
    %c0_89 = arith.constant 0 : index
    %389 = vector.load %arg12[%c11, %c0_88, %c0_89] : memref<16x8x128xf32, #tpu.memory_space<vmem>>, vector<1x8x128xf32>
    %390 = vector.shape_cast %389 : vector<1x8x128xf32> to vector<8x128xf32>
    %cst_90 = arith.constant dense<0.000000e+00> : vector<8x128xf32>
    %391 = tpu.matmul %388, %12, %cst_90 {dimension_numbers = #tpu.dot_dimension_numbers<[1], [0], [0], [1], [0, 0, 1, 1], [], []>} : vector<8x32xf32>, vector<32x128xf32>, vector<8x128xf32> -> vector<8x128xf32>
    %392 = arith.addf %390, %391 : vector<8x128xf32>
    %393 = vector.broadcast %23 : vector<1x128xf32> to vector<8x128xf32>
    %394 = arith.mulf %392, %393 : vector<8x128xf32>
    %395 = arith.negf %394 : vector<8x128xf32>
    %396 = math.exp %395 : vector<8x128xf32>
    %cst_91 = arith.constant 1.000000e+00 : f32
    %397 = vector.broadcast %cst_91 : f32 to vector<8x128xf32>
    %398 = arith.addf %397, %396 : vector<8x128xf32>
    %399 = arith.divf %397, %398 : vector<8x128xf32>
    %400 = vector.extract_strided_slice %399 {offsets = [0, 0], sizes = [8, 32], strides = [1, 1]} : vector<8x128xf32> to vector<8x32xf32>
    %401 = vector.extract_strided_slice %399 {offsets = [0, 32], sizes = [8, 32], strides = [1, 1]} : vector<8x128xf32> to vector<8x32xf32>
    %402 = vector.extract_strided_slice %399 {offsets = [0, 64], sizes = [8, 32], strides = [1, 1]} : vector<8x128xf32> to vector<8x32xf32>
    %cst_92 = arith.constant 2.000000e+00 : f32
    %403 = vector.broadcast %cst_92 : f32 to vector<8x32xf32>
    %404 = arith.mulf %403, %402 : vector<8x32xf32>
    %cst_93 = arith.constant 1.000000e+00 : f32
    %405 = vector.broadcast %cst_93 : f32 to vector<8x32xf32>
    %406 = arith.subf %404, %405 : vector<8x32xf32>
    %407 = vector.extract_strided_slice %399 {offsets = [0, 96], sizes = [8, 32], strides = [1, 1]} : vector<8x128xf32> to vector<8x32xf32>
    %408 = arith.mulf %401, %385 : vector<8x32xf32>
    %409 = arith.mulf %400, %406 : vector<8x32xf32>
    %410 = arith.addf %408, %409 : vector<8x32xf32>
    %411 = math.tanh %410 : vector<8x32xf32>
    %412 = arith.mulf %407, %411 : vector<8x32xf32>
    %c11_i32 = arith.constant 11 : i32
    %413 = arith.addi %14, %c11_i32 : i32
    %414 = vector.broadcast %413 : i32 to vector<8x1xi32>
    %415 = arith.cmpi slt, %414, %13 : vector<8x1xi32>
    %416 = vector.shape_cast %415 : vector<8x1xi1> to vector<8x1xi1>
    %417 = vector.broadcast %416 : vector<8x1xi1> to vector<8x32xi1>
    %418 = arith.select %417, %410, %385 : vector<8x32xi1>, vector<8x32xf32>
    %419 = vector.shape_cast %415 : vector<8x1xi1> to vector<8x1xi1>
    %420 = vector.broadcast %419 : vector<8x1xi1> to vector<8x32xi1>
    %421 = arith.select %420, %412, %388 : vector<8x32xi1>, vector<8x32xf32>
    %c12 = arith.constant 12 : index
    %c0_94 = arith.constant 0 : index
    %c0_95 = arith.constant 0 : index
    %422 = vector.load %arg12[%c12, %c0_94, %c0_95] : memref<16x8x128xf32, #tpu.memory_space<vmem>>, vector<1x8x128xf32>
    %423 = vector.shape_cast %422 : vector<1x8x128xf32> to vector<8x128xf32>
    %cst_96 = arith.constant dense<0.000000e+00> : vector<8x128xf32>
    %424 = tpu.matmul %421, %12, %cst_96 {dimension_numbers = #tpu.dot_dimension_numbers<[1], [0], [0], [1], [0, 0, 1, 1], [], []>} : vector<8x32xf32>, vector<32x128xf32>, vector<8x128xf32> -> vector<8x128xf32>
    %425 = arith.addf %423, %424 : vector<8x128xf32>
    %426 = vector.broadcast %23 : vector<1x128xf32> to vector<8x128xf32>
    %427 = arith.mulf %425, %426 : vector<8x128xf32>
    %428 = arith.negf %427 : vector<8x128xf32>
    %429 = math.exp %428 : vector<8x128xf32>
    %cst_97 = arith.constant 1.000000e+00 : f32
    %430 = vector.broadcast %cst_97 : f32 to vector<8x128xf32>
    %431 = arith.addf %430, %429 : vector<8x128xf32>
    %432 = arith.divf %430, %431 : vector<8x128xf32>
    %433 = vector.extract_strided_slice %432 {offsets = [0, 0], sizes = [8, 32], strides = [1, 1]} : vector<8x128xf32> to vector<8x32xf32>
    %434 = vector.extract_strided_slice %432 {offsets = [0, 32], sizes = [8, 32], strides = [1, 1]} : vector<8x128xf32> to vector<8x32xf32>
    %435 = vector.extract_strided_slice %432 {offsets = [0, 64], sizes = [8, 32], strides = [1, 1]} : vector<8x128xf32> to vector<8x32xf32>
    %cst_98 = arith.constant 2.000000e+00 : f32
    %436 = vector.broadcast %cst_98 : f32 to vector<8x32xf32>
    %437 = arith.mulf %436, %435 : vector<8x32xf32>
    %cst_99 = arith.constant 1.000000e+00 : f32
    %438 = vector.broadcast %cst_99 : f32 to vector<8x32xf32>
    %439 = arith.subf %437, %438 : vector<8x32xf32>
    %440 = vector.extract_strided_slice %432 {offsets = [0, 96], sizes = [8, 32], strides = [1, 1]} : vector<8x128xf32> to vector<8x32xf32>
    %441 = arith.mulf %434, %418 : vector<8x32xf32>
    %442 = arith.mulf %433, %439 : vector<8x32xf32>
    %443 = arith.addf %441, %442 : vector<8x32xf32>
    %444 = math.tanh %443 : vector<8x32xf32>
    %445 = arith.mulf %440, %444 : vector<8x32xf32>
    %c12_i32 = arith.constant 12 : i32
    %446 = arith.addi %14, %c12_i32 : i32
    %447 = vector.broadcast %446 : i32 to vector<8x1xi32>
    %448 = arith.cmpi slt, %447, %13 : vector<8x1xi32>
    %449 = vector.shape_cast %448 : vector<8x1xi1> to vector<8x1xi1>
    %450 = vector.broadcast %449 : vector<8x1xi1> to vector<8x32xi1>
    %451 = arith.select %450, %443, %418 : vector<8x32xi1>, vector<8x32xf32>
    %452 = vector.shape_cast %448 : vector<8x1xi1> to vector<8x1xi1>
    %453 = vector.broadcast %452 : vector<8x1xi1> to vector<8x32xi1>
    %454 = arith.select %453, %445, %421 : vector<8x32xi1>, vector<8x32xf32>
    %c13 = arith.constant 13 : index
    %c0_100 = arith.constant 0 : index
    %c0_101 = arith.constant 0 : index
    %455 = vector.load %arg12[%c13, %c0_100, %c0_101] : memref<16x8x128xf32, #tpu.memory_space<vmem>>, vector<1x8x128xf32>
    %456 = vector.shape_cast %455 : vector<1x8x128xf32> to vector<8x128xf32>
    %cst_102 = arith.constant dense<0.000000e+00> : vector<8x128xf32>
    %457 = tpu.matmul %454, %12, %cst_102 {dimension_numbers = #tpu.dot_dimension_numbers<[1], [0], [0], [1], [0, 0, 1, 1], [], []>} : vector<8x32xf32>, vector<32x128xf32>, vector<8x128xf32> -> vector<8x128xf32>
    %458 = arith.addf %456, %457 : vector<8x128xf32>
    %459 = vector.broadcast %23 : vector<1x128xf32> to vector<8x128xf32>
    %460 = arith.mulf %458, %459 : vector<8x128xf32>
    %461 = arith.negf %460 : vector<8x128xf32>
    %462 = math.exp %461 : vector<8x128xf32>
    %cst_103 = arith.constant 1.000000e+00 : f32
    %463 = vector.broadcast %cst_103 : f32 to vector<8x128xf32>
    %464 = arith.addf %463, %462 : vector<8x128xf32>
    %465 = arith.divf %463, %464 : vector<8x128xf32>
    %466 = vector.extract_strided_slice %465 {offsets = [0, 0], sizes = [8, 32], strides = [1, 1]} : vector<8x128xf32> to vector<8x32xf32>
    %467 = vector.extract_strided_slice %465 {offsets = [0, 32], sizes = [8, 32], strides = [1, 1]} : vector<8x128xf32> to vector<8x32xf32>
    %468 = vector.extract_strided_slice %465 {offsets = [0, 64], sizes = [8, 32], strides = [1, 1]} : vector<8x128xf32> to vector<8x32xf32>
    %cst_104 = arith.constant 2.000000e+00 : f32
    %469 = vector.broadcast %cst_104 : f32 to vector<8x32xf32>
    %470 = arith.mulf %469, %468 : vector<8x32xf32>
    %cst_105 = arith.constant 1.000000e+00 : f32
    %471 = vector.broadcast %cst_105 : f32 to vector<8x32xf32>
    %472 = arith.subf %470, %471 : vector<8x32xf32>
    %473 = vector.extract_strided_slice %465 {offsets = [0, 96], sizes = [8, 32], strides = [1, 1]} : vector<8x128xf32> to vector<8x32xf32>
    %474 = arith.mulf %467, %451 : vector<8x32xf32>
    %475 = arith.mulf %466, %472 : vector<8x32xf32>
    %476 = arith.addf %474, %475 : vector<8x32xf32>
    %477 = math.tanh %476 : vector<8x32xf32>
    %478 = arith.mulf %473, %477 : vector<8x32xf32>
    %c13_i32 = arith.constant 13 : i32
    %479 = arith.addi %14, %c13_i32 : i32
    %480 = vector.broadcast %479 : i32 to vector<8x1xi32>
    %481 = arith.cmpi slt, %480, %13 : vector<8x1xi32>
    %482 = vector.shape_cast %481 : vector<8x1xi1> to vector<8x1xi1>
    %483 = vector.broadcast %482 : vector<8x1xi1> to vector<8x32xi1>
    %484 = arith.select %483, %476, %451 : vector<8x32xi1>, vector<8x32xf32>
    %485 = vector.shape_cast %481 : vector<8x1xi1> to vector<8x1xi1>
    %486 = vector.broadcast %485 : vector<8x1xi1> to vector<8x32xi1>
    %487 = arith.select %486, %478, %454 : vector<8x32xi1>, vector<8x32xf32>
    %c14 = arith.constant 14 : index
    %c0_106 = arith.constant 0 : index
    %c0_107 = arith.constant 0 : index
    %488 = vector.load %arg12[%c14, %c0_106, %c0_107] : memref<16x8x128xf32, #tpu.memory_space<vmem>>, vector<1x8x128xf32>
    %489 = vector.shape_cast %488 : vector<1x8x128xf32> to vector<8x128xf32>
    %cst_108 = arith.constant dense<0.000000e+00> : vector<8x128xf32>
    %490 = tpu.matmul %487, %12, %cst_108 {dimension_numbers = #tpu.dot_dimension_numbers<[1], [0], [0], [1], [0, 0, 1, 1], [], []>} : vector<8x32xf32>, vector<32x128xf32>, vector<8x128xf32> -> vector<8x128xf32>
    %491 = arith.addf %489, %490 : vector<8x128xf32>
    %492 = vector.broadcast %23 : vector<1x128xf32> to vector<8x128xf32>
    %493 = arith.mulf %491, %492 : vector<8x128xf32>
    %494 = arith.negf %493 : vector<8x128xf32>
    %495 = math.exp %494 : vector<8x128xf32>
    %cst_109 = arith.constant 1.000000e+00 : f32
    %496 = vector.broadcast %cst_109 : f32 to vector<8x128xf32>
    %497 = arith.addf %496, %495 : vector<8x128xf32>
    %498 = arith.divf %496, %497 : vector<8x128xf32>
    %499 = vector.extract_strided_slice %498 {offsets = [0, 0], sizes = [8, 32], strides = [1, 1]} : vector<8x128xf32> to vector<8x32xf32>
    %500 = vector.extract_strided_slice %498 {offsets = [0, 32], sizes = [8, 32], strides = [1, 1]} : vector<8x128xf32> to vector<8x32xf32>
    %501 = vector.extract_strided_slice %498 {offsets = [0, 64], sizes = [8, 32], strides = [1, 1]} : vector<8x128xf32> to vector<8x32xf32>
    %cst_110 = arith.constant 2.000000e+00 : f32
    %502 = vector.broadcast %cst_110 : f32 to vector<8x32xf32>
    %503 = arith.mulf %502, %501 : vector<8x32xf32>
    %cst_111 = arith.constant 1.000000e+00 : f32
    %504 = vector.broadcast %cst_111 : f32 to vector<8x32xf32>
    %505 = arith.subf %503, %504 : vector<8x32xf32>
    %506 = vector.extract_strided_slice %498 {offsets = [0, 96], sizes = [8, 32], strides = [1, 1]} : vector<8x128xf32> to vector<8x32xf32>
    %507 = arith.mulf %500, %484 : vector<8x32xf32>
    %508 = arith.mulf %499, %505 : vector<8x32xf32>
    %509 = arith.addf %507, %508 : vector<8x32xf32>
    %510 = math.tanh %509 : vector<8x32xf32>
    %511 = arith.mulf %506, %510 : vector<8x32xf32>
    %c14_i32 = arith.constant 14 : i32
    %512 = arith.addi %14, %c14_i32 : i32
    %513 = vector.broadcast %512 : i32 to vector<8x1xi32>
    %514 = arith.cmpi slt, %513, %13 : vector<8x1xi32>
    %515 = vector.shape_cast %514 : vector<8x1xi1> to vector<8x1xi1>
    %516 = vector.broadcast %515 : vector<8x1xi1> to vector<8x32xi1>
    %517 = arith.select %516, %509, %484 : vector<8x32xi1>, vector<8x32xf32>
    %518 = vector.shape_cast %514 : vector<8x1xi1> to vector<8x1xi1>
    %519 = vector.broadcast %518 : vector<8x1xi1> to vector<8x32xi1>
    %520 = arith.select %519, %511, %487 : vector<8x32xi1>, vector<8x32xf32>
    %c15 = arith.constant 15 : index
    %c0_112 = arith.constant 0 : index
    %c0_113 = arith.constant 0 : index
    %521 = vector.load %arg12[%c15, %c0_112, %c0_113] : memref<16x8x128xf32, #tpu.memory_space<vmem>>, vector<1x8x128xf32>
    %522 = vector.shape_cast %521 : vector<1x8x128xf32> to vector<8x128xf32>
    %cst_114 = arith.constant dense<0.000000e+00> : vector<8x128xf32>
    %523 = tpu.matmul %520, %12, %cst_114 {dimension_numbers = #tpu.dot_dimension_numbers<[1], [0], [0], [1], [0, 0, 1, 1], [], []>} : vector<8x32xf32>, vector<32x128xf32>, vector<8x128xf32> -> vector<8x128xf32>
    %524 = arith.addf %522, %523 : vector<8x128xf32>
    %525 = vector.broadcast %23 : vector<1x128xf32> to vector<8x128xf32>
    %526 = arith.mulf %524, %525 : vector<8x128xf32>
    %527 = arith.negf %526 : vector<8x128xf32>
    %528 = math.exp %527 : vector<8x128xf32>
    %cst_115 = arith.constant 1.000000e+00 : f32
    %529 = vector.broadcast %cst_115 : f32 to vector<8x128xf32>
    %530 = arith.addf %529, %528 : vector<8x128xf32>
    %531 = arith.divf %529, %530 : vector<8x128xf32>
    %532 = vector.extract_strided_slice %531 {offsets = [0, 0], sizes = [8, 32], strides = [1, 1]} : vector<8x128xf32> to vector<8x32xf32>
    %533 = vector.extract_strided_slice %531 {offsets = [0, 32], sizes = [8, 32], strides = [1, 1]} : vector<8x128xf32> to vector<8x32xf32>
    %534 = vector.extract_strided_slice %531 {offsets = [0, 64], sizes = [8, 32], strides = [1, 1]} : vector<8x128xf32> to vector<8x32xf32>
    %cst_116 = arith.constant 2.000000e+00 : f32
    %535 = vector.broadcast %cst_116 : f32 to vector<8x32xf32>
    %536 = arith.mulf %535, %534 : vector<8x32xf32>
    %cst_117 = arith.constant 1.000000e+00 : f32
    %537 = vector.broadcast %cst_117 : f32 to vector<8x32xf32>
    %538 = arith.subf %536, %537 : vector<8x32xf32>
    %539 = vector.extract_strided_slice %531 {offsets = [0, 96], sizes = [8, 32], strides = [1, 1]} : vector<8x128xf32> to vector<8x32xf32>
    %540 = arith.mulf %533, %517 : vector<8x32xf32>
    %541 = arith.mulf %532, %538 : vector<8x32xf32>
    %542 = arith.addf %540, %541 : vector<8x32xf32>
    %543 = math.tanh %542 : vector<8x32xf32>
    %544 = arith.mulf %539, %543 : vector<8x32xf32>
    %c15_i32 = arith.constant 15 : i32
    %545 = arith.addi %14, %c15_i32 : i32
    %546 = vector.broadcast %545 : i32 to vector<8x1xi32>
    %547 = arith.cmpi slt, %546, %13 : vector<8x1xi32>
    %548 = vector.shape_cast %547 : vector<8x1xi1> to vector<8x1xi1>
    %549 = vector.broadcast %548 : vector<8x1xi1> to vector<8x32xi1>
    %550 = arith.select %549, %542, %517 : vector<8x32xi1>, vector<8x32xf32>
    %551 = vector.shape_cast %547 : vector<8x1xi1> to vector<8x1xi1>
    %552 = vector.broadcast %551 : vector<8x1xi1> to vector<8x32xi1>
    %553 = arith.select %552, %544, %520 : vector<8x32xi1>, vector<8x32xf32>
    %c0_118 = arith.constant 0 : index
    %c0_119 = arith.constant 0 : index
    %554 = vector.load %arg10[%c0_118, %c0_119] : memref<8x32xf32, #tpu.memory_space<vmem>>, vector<8x32xf32>
    tpu.vector_store %arg10[%c0_118, %c0_119], %553 {strides = array<i32>} : memref<8x32xf32, #tpu.memory_space<vmem>>, vector<8x32xf32>,
    %c0_120 = arith.constant 0 : index
    %c0_121 = arith.constant 0 : index
    %555 = vector.load %arg11[%c0_120, %c0_121] : memref<8x32xf32, #tpu.memory_space<vmem>>, vector<8x32xf32>
    tpu.vector_store %arg11[%c0_120, %c0_121], %550 {strides = array<i32>} : memref<8x32xf32, #tpu.memory_space<vmem>>, vector<8x32xf32>,
    %c0_i32_122 = arith.constant 0 : i32
    %556 = arith.cmpi eq, %arg1, %c0_i32_122 : i32
    %557 = arith.extui %556 : i1 to i32
    %c0_i32_123 = arith.constant 0 : i32
    %558 = arith.cmpi ne, %557, %c0_i32_123 : i32
    scf.if %558 {
      %c0_124 = arith.constant 0 : index
      %c0_125 = arith.constant 0 : index
      %559 = vector.load %arg7[%c0_124, %c0_125] : memref<32x16xf32, #tpu.memory_space<vmem>>, vector<32x16xf32>
      %cst_126 = arith.constant dense<0.000000e+00> : vector<8x16xf32>
      %560 = tpu.matmul %553, %559, %cst_126 {dimension_numbers = #tpu.dot_dimension_numbers<[1], [0], [0], [1], [0, 0, 1, 1], [], []>} : vector<8x32xf32>, vector<32x16xf32>, vector<8x16xf32> -> vector<8x16xf32>
      %c0_127 = arith.constant 0 : index
      %c0_128 = arith.constant 0 : index
      %561 = vector.load %arg8[%c0_127, %c0_128] : memref<1x16xf32, #tpu.memory_space<vmem>>, vector<1x16xf32>
      %562 = vector.broadcast %561 : vector<1x16xf32> to vector<8x16xf32>
      %563 = arith.addf %560, %562 : vector<8x16xf32>
      %c0_129 = arith.constant 0 : index
      %c0_130 = arith.constant 0 : index
      %564 = vector.load %arg9[%c0_129, %c0_130] : memref<8x16xf32, #tpu.memory_space<vmem>>, vector<8x16xf32>
      tpu.vector_store %arg9[%c0_129, %c0_130], %563 {strides = array<i32>} : memref<8x16xf32, #tpu.memory_space<vmem>>, vector<8x16xf32>,
    } else {
    }
    return
  }
  func.func @transform_0(%arg0: i32, %arg1: i32) -> (i32, i32, i32) {
    %c0_i32 = arith.constant 0 : i32
    %c0_i32_0 = arith.constant 0 : i32
    return %arg1, %arg0, %c0_i32 : i32, i32, i32
  }
  func.func @transform_1(%arg0: i32, %arg1: i32) -> (i32, i32) {
    %c0_i32 = arith.constant 0 : i32
    %c0_i32_0 = arith.constant 0 : i32
    return %arg0, %c0_i32 : i32, i32
  }
  func.func @transform_2(%arg0: i32, %arg1: i32) -> (i32, i32) {
    %c0_i32 = arith.constant 0 : i32
    %c0_i32_0 = arith.constant 0 : i32
    %c0_i32_1 = arith.constant 0 : i32
    return %c0_i32, %c0_i32_0 : i32, i32
  }
  func.func @transform_3(%arg0: i32, %arg1: i32) -> (i32, i32) {
    %c0_i32 = arith.constant 0 : i32
    %c0_i32_0 = arith.constant 0 : i32
    %c0_i32_1 = arith.constant 0 : i32
    return %c0_i32, %c0_i32_0 : i32, i32
  }
  func.func @transform_4(%arg0: i32, %arg1: i32) -> (i32, i32) {
    %c0_i32 = arith.constant 0 : i32
    %c0_i32_0 = arith.constant 0 : i32
    %c0_i32_1 = arith.constant 0 : i32
    return %c0_i32, %c0_i32_0 : i32, i32
  }
  func.func @transform_5(%arg0: i32, %arg1: i32) -> (i32, i32) {
    %c0_i32 = arith.constant 0 : i32
    %c0_i32_0 = arith.constant 0 : i32
    %c0_i32_1 = arith.constant 0 : i32
    return %c0_i32, %c0_i32_0 : i32, i32
  }
  func.func @transform_6(%arg0: i32, %arg1: i32) -> (i32, i32) {
    %c0_i32 = arith.constant 0 : i32
    %c0_i32_0 = arith.constant 0 : i32
    %c0_i32_1 = arith.constant 0 : i32
    return %c0_i32, %c0_i32_0 : i32, i32
  }
  func.func @transform_7(%arg0: i32, %arg1: i32) -> (i32, i32) {
    %c0_i32 = arith.constant 0 : i32
    %c0_i32_0 = arith.constant 0 : i32
    return %arg0, %c0_i32 : i32, i32
  }
}

</mosaic_0001>

<bundles_post_ra>
// kernel: tpu_custom_call.1
= control target key start
LH: loop header
LB: loop body
LE: loop exit
PB: predicated region body
PF: predicated region fallthrough
CT: control target
= control target key end

     0   :  { %12 = vsyncpa [#allocation6], 0  ;;  %s3401_s0 = inlined_call_operand.hbm [shape: f32[16,8,32], index: 0, kind: input, shape index: {}]   ;;  %s3402_s1 = inlined_call_operand.vmem [shape: s32[8,1], index: 1, kind: input, shape index: {}]   ;;  %s3403_s2 = inlined_call_operand.vmem [shape: f32[32,128], index: 2, kind: input, shape index: {}]   ;;  %s3404_s3 = inlined_call_operand.vmem [shape: f32[32,128], index: 3, kind: input, shape index: {}]   ;;  %s3405_s4 = inlined_call_operand.vmem [shape: f32[1,128], index: 4, kind: input, shape index: {}]   ;;  %s3406_s5 = inlined_call_operand.vmem [shape: f32[32,16], index: 5, kind: input, shape index: {}]   ;;  %s3407_s6 = inlined_call_operand.vmem [shape: f32[1,16], index: 6, kind: input, shape index: {}]   ;;  %s3408_s7 = inlined_call_operand.hbm [shape: f32[8,16], index: 7, kind: output, shape index: {}]  }
   0x1   :  { %13 = vsyncpa [#allocation7], 0  ;;  %s2916_s24 = smov [#allocation5]   ;;  %s2868_s28 = scalar_lea.hbm %s3401_s0, 2048 }
   0x2   :  { %s19_s25 = sshll.u32 %s2916_s24, 4  ;;  %p2869_p0 = scmp.ne.s32.totalorder %s3401_s0, %s2868_s28  ;;  %s20_s25 = int_to_ptr.vmem [resolvable:$true] %s19_s25 }
   0x3   :  { %p2872_p1 = scmp.lt.u32.totalorder %s2868_s28, %s3401_s0 }
   0x5   :  { %p2874_p2 = pnand %p2872_p1, %p2869_p0 }
   0x7   :  { %2877 = shalt.err (!%p2874_p2)
}
   0x8   :  { %s2878_s10 = scalar_lea.vmem %s20_s25, 2048  ;;  %p2883_p4 = scmp.lt.s32.totalorder %s20_s25, %s20_s25 }
   0x9   :  { %p2879_p3 = scmp.ne.s32.totalorder %s20_s25, %s2878_s10  ;;  %p2884_p5 = scmp.lt.s32.totalorder %s2878_s10, %s2878_s10 }
   0xb   :  { %p2885_p6 = por %p2884_p5, %p2883_p4 }
   0xd   :  { %p2886_p7 = pnand %p2885_p6, %p2879_p3 }
   0xf   :  { %2889 = shalt.err (!%p2886_p7)
}
  0x10   :  { %s2917_s11 = smov 128   ;;  %s2918_s12 = smov 8  }
  0x11   :  { %25 = dma.hbm_to_vmem [thread:$0]  %s3401_s0, 2048, %s20_s25, [#allocation6], %s2917_s11, %s2917_s11, %s2918_s12  }
  0x12   :  { %2912 = dma.done.wait [#allocation6], 2048  }
  0x13   :  { %2913 = vsyncadd [#allocation6], 4294965248  ;;  %vm45_vm0 = vcmask 261120   ;;  %v2919_v0 = vmov 0.0|0.0   ;;  %vm2920_vm1 = vmmov 0   ;;  %v2921_v1 = vmov 0.0  }
  0x14   :  { %2654 = vmatprep.subr.bf16.mxu1 %v2919_v0  ;;  %2467 = vmatprep.mubr.msk.f32.mxu1 %vm2920_vm1, %v2921_v1  ;;  %46 = vst.msk [vmem:[#allocation2] sm:$0xff] %vm45_vm0, %v2921_v1  ;;  %47 = vst.msk [vmem:[#allocation3] sm:$0xff] %vm45_vm0, %v2921_v1  ;;  %v64_v2 = vld [vmem:[%s3403_s2] sm:$0xff]  ;;  %v65_v3 = vld [vmem:[%s3403_s2 + $0x8] sm:$0xff]  ;;  %v291_v17 = vlaneseq  ;;  %v2922_v25 = vmov 1.0   ;;  %v2923_v32 = vmov 0  }
  0x15   :  { %v285_v4 = vld [vmem:[%s3404_s3] sm:$0xff]  ;;  %v2646_v5 = vpack.c.bf16 %v65_v3, %v64_v2  ;;  %v286_v6 = vld [vmem:[%s3404_s3 + $0x8] sm:$0xff]  ;;  %v66_v7 = vld [vmem:[%s3403_s2 + $0x10] sm:$0xff]  ;;  %2768 = vset.pattern.permute.xlu1 %v2923_v32  ;;  %2769 = vset.pattern.permute.xlu0 %v2923_v32  ;;  %s2924_s30 = smov 64   ;;  %s2925_s8 = smov 32  }
  0x16   :  { %v67_v8 = vld [vmem:[%s3403_s2 + $0x18] sm:$0xff]  ;;  %v3005_v9 = vpack.c.bf16 %v286_v6, %v285_v4  ;;  %v48_v11 = vld [vmem:[#allocation5] sm:$0xff]  ;;  %v292_v18 = vand.u32 127, %v291_v17  ;;  %v3036_v19 = vld [vmem:[%s3405_s4] ss:$0 sm:$0xff]  ;;  %s2926_s11 = smov 96  }
  0x17   :  { %v2650_v10 = vpack.c.bf16 %v67_v8, %v66_v7  ;;  %v287_v12 = vld [vmem:[%s3404_s3 + $0x10] sm:$0xff]  ;;  %v288_v13 = vld [vmem:[%s3404_s3 + $0x18] sm:$0xff]  ;;  %2647 = vmatprep.subr.bf16.mxu0 %v2646_v5  ;;  %2435 = vmatprep.mubr.msk.f32.mxu0 %vm45_vm0, %v48_v11  ;;  %v3049_v37 = vld [vmem:[%s3402_s1] sm:$0xff]  ;;  %s2927_s22 = smov [#allocation8]  }
  0x18   :  { %2649 = vmatpush3.bf16.msra.mxu0 %v2646_v5  ;;  %2656 = vmatpush3.bf16.msra.mxu1 %v3005_v9  ;;  %v3015_v14 = vpack.c.bf16 %v288_v13, %v287_v12  ;;  %v49_v15 = vld [vmem:[#allocation5 + $0x8] sm:$0xff]  ;;  %vm293_vm2 = vcmp.ge.s32.totalorder %v292_v18, 64  ;;  %vm294_vm3 = vcmp.lt.s32.totalorder %v292_v18, 96  ;;  %vm2259_vm5 = vcmp.gt.s32.totalorder %v3049_v37, 0  ;;  %v50_v8 = vld [vmem:[#allocation5 + $0x10] sm:$0xff]  ;;  %s2230_s23 = sshll.u32 %s2927_s22, 4  ;;  %s2231_s23 = int_to_ptr.vmem [resolvable:$true] %s2230_s23 }
  0x19   :  { %2651 = vmatprep.subr.bf16.mxu0 %v2650_v10  ;;  %2657 = vmatprep.subr.bf16.mxu1 %v2919_v0  ;;  %vm295_vm4 = vmand %vm293_vm2, %vm294_vm3  ;;  %v406_v40 = vsel %vm2259_vm5, 1, %v2923_v32  ;;  %vm2263_vm7 = vcmp.gt.s32.totalorder %v3049_v37, 1  ;;  %vm2267_vm9 = vcmp.gt.s32.totalorder %v3049_v37, 2  ;;  %vm2271_vm11 = vcmp.gt.s32.totalorder %v3049_v37, 3  ;;  %s2890_s24 = scalar_lea.vmem %s2231_s23, 128  ;;  %p2895_p9 = scmp.lt.s32.totalorder %s2231_s23, %s2231_s23 }
  0x1a   :  { %v3039_v26 = vsel %vm295_vm4, 2.0, %v2922_v25  ;;  %v523_v63 = vsel %vm2263_vm7, 1, %v2923_v32  ;;  %vm2275_vm13 = vcmp.gt.s32.totalorder %v3049_v37, 4  ;;  %vm2279_vm15 = vcmp.gt.s32.totalorder %v3049_v37, 5  ;;  %p2891_p8 = scmp.ne.s32.totalorder %s2231_s23, %s2890_s24  ;;  %p2896_p10 = scmp.lt.s32.totalorder %s2890_s24, %s2890_s24 }
  0x1b   :  { %v297_v16 = vld [vmem:[#allocation2] sm:$0xff]  ;;  %v298_v36 = vld [vmem:[#allocation3] sm:$0xff]  ;;  %vm2283_vm3 = vcmp.gt.s32.totalorder %v3049_v37, 6  ;;  %vm2287_vm5 = vcmp.gt.s32.totalorder %v3049_v37, 7  ;;  %vm2291_vm7 = vcmp.gt.s32.totalorder %v3049_v37, 8 }
  0x1c   :  { %2653 = vmatpush3.bf16.msra.mxu0 %v2650_v10  ;;  %2659 = vmatpush3.bf16.msra.mxu1 %v3015_v14  ;;  %v51_v10 = vld [vmem:[#allocation5 + $0x18] sm:$0xff]  ;;  %p2897_p11 = por %p2896_p10, %p2895_p9 }
  0x1d   :  { %2660 = vmatprep.subr.bf16.mxu1 %v2919_v0  ;;  %2678 = vmatprep.subr.bf16.mxu0 %v2919_v0 }
  0x1e   :  { %p2898_p12 = pnand %p2897_p11, %p2891_p8 }
  0x1f   :  { %2436 = vmatmul.mubr.msk.f32.vlgmr.msra.gmra.mrb[0].mxu0 %vm45_vm0, %v49_v15  ;;  %2468 = vmatmul.mubr.msk.f32.vlgmr.msra.gmra.mrb[0].mxu1 %vm45_vm0, %v297_v16 }
  0x20   :  { %2662 = vmatpush3.bf16.msra.mxu1 %v3005_v9  ;;  %2478 = vmatprep.mubr.msk.f32.mxu1 %vm2920_vm1, %v2921_v1 }
  0x21   :  { %2663 = vmatprep.subr.bf16.mxu1 %v2919_v0  ;;  %2680 = vmatpush3.bf16.msra.mxu0 %v3005_v9 }
  0x22   :  { %2681 = vmatprep.subr.bf16.mxu0 %v2919_v0  ;;  %2438 = vmatprep.mubr.msk.f32.mxu0 %vm45_vm0, %v50_v8  ;;  %v56_v8 = vld [vmem:[#allocation5 + $0x40] sm:$0xff] }
  0x23   :  { %2439 = vmatmul.mubr.msk.f32.gmra.mrb[2].mxu0 %vm45_vm0, %v51_v10  ;;  %v57_v10 = vld [vmem:[#allocation5 + $0x48] sm:$0xff] }
  0x24   :  { %2665 = vmatpush3.bf16.msra.mxu1 %v3015_v14 }
  0x25   :  { %2666 = vmatprep.subr.bf16.mxu1 %v2919_v0  ;;  %2683 = vmatpush3.bf16.msra.mxu0 %v3015_v14 }
  0x26   :  { %2690 = vmatprep.subr.bf16.mxu0 %v2919_v0 }
  0xf2   :  { %v2437_v20 = vpop.f32.mrb[0].mxu0  ;;  %v369_v21 = vpop.f32.mrb[0].mxu1 }
  0xf3   :  { %v190_v22 = vpop.f32.mrb[1].mxu0  ;;  %v2469_v23 = vpop.f32.mrb[1].mxu1  ;;  %v196_v52 = vadd.f32 %v2437_v20, %v3036_v19 }
  0xf4   :  { %v191_v24 = vadd.f32 %v3036_v19, %v190_v22 }
  0xf6   :  { %v373_v27 = vadd.f32 %v369_v21, %v191_v24  ;;  %v2440_v17 = vpop.f32.mrb[2].mxu0 }
  0xf7   :  { %v200_v18 = vpop.f32.mrb[3].mxu0 }
  0xf8   :  { %v374_v28 = vmul.f32 %v373_v27, %v3039_v26  ;;  %v201_v21 = vadd.f32 %v3036_v19, %v200_v18  ;;  %v63_v18 = vld [vmem:[#allocation5 + $0x78] sm:$0xff] }
  0xfa   :  { %v2257_v29 = vmul.f32 -1.442695, %v374_v28 }
  0xfc   :  { %2770 = vpow2.f32 %v2257_v29 }
 0x106   :  { %v2771_v30 = vpop.eup %2770 }
 0x107   :  { %v378_v31 = vadd.f32 1.0, %v2771_v30 }
 0x109   :  { %2772 = vrcp.f32 %v378_v31 }
 0x113   :  { %v2773_v33 = vpop.eup %2772 }
 0x114   :  { %v381_v34 = vmul.f32 2.0, %v2773_v33 }
 0x116   :  { %v2258_v35 = vadd.f32 -1.0, %v381_v34  ;;  %v637_v34 = vsel %vm2267_vm9, 1, %v2923_v32  ;;  %vm2295_vm9 = vcmp.gt.s32.totalorder %v3049_v37, 9 }
 0x118   :  { %389 = vrot.lane.b32.xlu0 %v2258_v35, %s2924_s30 }
 0x11c   :  { %384 = vrot.lane.b32.xlu0 %v298_v36, %s2925_s8 }
 0x18a   :  { %v390_v38 = vpop.permute.xlu0 %389 }
 0x18b   :  { %v392_v39 = vmul.f32 %v2773_v33, %v390_v38 }
 0x18d   :  { %394 = vrot.lane.b32.xlu1 %v392_v39, %s2925_s8 }
 0x18e   :  { %v385_v41 = vpop.permute.xlu0 %384 }
 0x18f   :  { %v387_v42 = vmul.f32 %v2773_v33, %v385_v41 }
 0x191   :  { %408 = vperm.xlu1 %2768, %v406_v40  }
 0x195   :  { %412 = vrot.lane.b32.xlu1 %v297_v16, %s2926_s11 }
 0x1ff   :  { %v395_v43 = vpop.permute.xlu1 %394 }
 0x200   :  { %v397_v44 = vadd.f32 %v395_v43, %v387_v42 }
 0x202   :  { %2774 = vtanh.f32 %v397_v44 }
 0x20c   :  { %v2775_v45 = vpop.eup %2774 }
 0x20d   :  { %400 = vrot.lane.b32.xlu0 %v2775_v45, %s2924_s30 }
 0x210   :  { %v409_v46 = vpop.permute.xlu1 %408 }
 0x211   :  { %vm410_vm6 = vcmp.eq.s32.totalorder %v409_v46, 1 }
 0x212   :  { %v411_v4 = vsel %vm410_vm6, %v397_v44, %v385_v41 }
 0x214   :  { %v413_v48 = vpop.permute.xlu1 %412 }
 0x27f   :  { %v401_v47 = vpop.permute.xlu0 %400 }
 0x280   :  { %v403_v49 = vmul.f32 %v2773_v33, %v401_v47 }
 0x282   :  { %v415_v50 = vsel %vm410_vm6, %v403_v49, %v413_v48  ;;  %v206_v48 = vadd.f32 %v2440_v17, %v3036_v19  ;;  %v62_v17 = vld [vmem:[#allocation5 + $0x70] sm:$0xff] }
 0x283   :  { %419 = vrot.lane.b32.xlu0 %v415_v50, %s2925_s8 }
 0x2f5   :  { %v420_v51 = vpop.permute.xlu0 %419 }
 0x2f6   :  { %2479 = vmatmul.mubr.msk.f32.vlgmr.msra.gmra.mrb[2].mxu1 %vm45_vm0, %v420_v51 }
 0x2f7   :  { %2668 = vmatpush3.bf16.msra.mxu1 %v3005_v9  ;;  %2489 = vmatprep.mubr.msk.f32.mxu1 %vm2920_vm1, %v2921_v1 }
 0x2f8   :  { %2669 = vmatprep.subr.bf16.mxu1 %v2919_v0 }
 0x2fb   :  { %2671 = vmatpush3.bf16.msra.mxu1 %v3015_v14 }
 0x2fc   :  { %2672 = vmatprep.subr.bf16.mxu1 %v2919_v0 }
 0x3c9   :  { %v489_v53 = vpop.f32.mrb[2].mxu1 }
 0x3ca   :  { %v493_v54 = vadd.f32 %v489_v53, %v196_v52  ;;  %v2480_v55 = vpop.f32.mrb[3].mxu1 }
 0x3cc   :  { %v494_v56 = vmul.f32 %v493_v54, %v3039_v26 }
 0x3ce   :  { %v2261_v57 = vmul.f32 -1.442695, %v494_v56 }
 0x3d0   :  { %2776 = vpow2.f32 %v2261_v57 }
 0x3da   :  { %v2777_v58 = vpop.eup %2776 }
 0x3db   :  { %v498_v59 = vadd.f32 1.0, %v2777_v58 }
 0x3dd   :  { %2778 = vrcp.f32 %v498_v59  ;;  %v751_v59 = vsel %vm2271_vm11, 1, %v2923_v32  ;;  %vm2299_vm11 = vcmp.gt.s32.totalorder %v3049_v37, 10 }
 0x3e7   :  { %v2779_v60 = vpop.eup %2778 }
 0x3e8   :  { %v501_v61 = vmul.f32 2.0, %v2779_v60  ;;  %v503_v5 = vmul.f32 %v2779_v60, %v411_v4 }
 0x3ea   :  { %v2262_v62 = vadd.f32 -1.0, %v501_v61 }
 0x3ec   :  { %505 = vrot.lane.b32.xlu1 %v2262_v62, %s2924_s30 }
 0x3f0   :  { %525 = vperm.xlu1 %2768, %v523_v63  }
 0x45e   :  { %v506_v2 = vpop.permute.xlu1 %505 }
 0x45f   :  { %v508_v3 = vmul.f32 %v2779_v60, %v506_v2 }
 0x461   :  { %510 = vrot.lane.b32.xlu0 %v508_v3, %s2925_s8 }
 0x46f   :  { %v526_v12 = vpop.permute.xlu1 %525 }
 0x470   :  { %vm527_vm8 = vcmp.eq.s32.totalorder %v526_v12, 1 }
 0x4d3   :  { %v511_v6 = vpop.permute.xlu0 %510 }
 0x4d4   :  { %v513_v7 = vadd.f32 %v511_v6, %v503_v5  ;;  %v53_v5 = vld [vmem:[#allocation5 + $0x28] sm:$0xff]  ;;  %v54_v6 = vld [vmem:[#allocation5 + $0x30] sm:$0xff] }
 0x4d6   :  { %2780 = vtanh.f32 %v513_v7  ;;  %v528_v38 = vsel %vm527_vm8, %v513_v7, %v411_v4  ;;  %v52_v4 = vld [vmem:[#allocation5 + $0x20] sm:$0xff]  ;;  %v55_v7 = vld [vmem:[#allocation5 + $0x38] sm:$0xff] }
 0x4d7   :  { %2441 = vmatprep.mubr.msk.f32.mxu0 %vm45_vm0, %v52_v4 }
 0x4d8   :  { %2442 = vmatmul.mubr.msk.f32.gmra.mrb[4].mxu0 %vm45_vm0, %v53_v5 }
 0x4d9   :  { %2444 = vmatprep.mubr.msk.f32.mxu0 %vm45_vm0, %v54_v6 }
 0x4dc   :  { %2445 = vmatmul.mubr.msk.f32.gmra.mrb[6].mxu0 %vm45_vm0, %v55_v7 }
 0x4dd   :  { %2447 = vmatprep.mubr.msk.f32.mxu0 %vm45_vm0, %v56_v8 }
 0x4e0   :  { %v2781_v11 = vpop.eup %2780  ;;  %2448 = vmatmul.mubr.msk.f32.gmra.mrb[8].mxu0 %vm45_vm0, %v57_v10 }
 0x4e1   :  { %516 = vrot.lane.b32.xlu0 %v2781_v11, %s2924_s30  ;;  %v58_v11 = vld [vmem:[#allocation5 + $0x50] sm:$0xff] }
 0x4e2   :  { %2450 = vmatprep.mubr.msk.f32.mxu0 %vm45_vm0, %v58_v11 }
 0x553   :  { %v517_v13 = vpop.permute.xlu0 %516 }
 0x554   :  { %v519_v15 = vmul.f32 %v2779_v60, %v517_v13  ;;  %v59_v13 = vld [vmem:[#allocation5 + $0x58] sm:$0xff] }
 0x555   :  { %2451 = vmatmul.mubr.msk.f32.gmra.mrb[10].mxu0 %vm45_vm0, %v59_v13 }
 0x556   :  { %v529_v16 = vsel %vm527_vm8, %v519_v15, %v415_v50  ;;  %v60_v15 = vld [vmem:[#allocation5 + $0x60] sm:$0xff] }
 0x557   :  { %533 = vrot.lane.b32.xlu1 %v529_v16, %s2925_s8  ;;  %2453 = vmatprep.mubr.msk.f32.mxu0 %vm45_vm0, %v60_v15  ;;  %v979_v15 = vsel %vm2279_vm15, 1, %v2923_v32 }
 0x5c9   :  { %v534_v20 = vpop.permute.xlu1 %533 }
 0x5ca   :  { %2490 = vmatmul.mubr.msk.f32.vlgmr.msra.gmra.mrb[4].mxu1 %vm45_vm0, %v534_v20 }
 0x5cb   :  { %2674 = vmatpush3.bf16.msra.mxu1 %v3005_v9  ;;  %2500 = vmatprep.mubr.msk.f32.mxu1 %vm2920_vm1, %v2921_v1 }
 0x5cc   :  { %2675 = vmatprep.subr.bf16.mxu1 %v2919_v0 }
 0x5cf   :  { %2677 = vmatpush3.bf16.msra.mxu1 %v3015_v14 }
 0x5d0   :  { %2684 = vmatprep.subr.bf16.mxu1 %v2919_v0 }
 0x69d   :  { %v603_v22 = vpop.f32.mrb[4].mxu1 }
 0x69e   :  { %v607_v23 = vadd.f32 %v603_v22, %v201_v21  ;;  %v2491_v24 = vpop.f32.mrb[5].mxu1 }
 0x69f   :  { %v2443_v24 = vpop.f32.mrb[4].mxu0 }
 0x6a0   :  { %v608_v25 = vmul.f32 %v607_v23, %v3039_v26 }
 0x6a2   :  { %v2265_v27 = vmul.f32 -1.442695, %v608_v25  ;;  %v210_v25 = vpop.f32.mrb[5].mxu0 }
 0x6a4   :  { %2782 = vpow2.f32 %v2265_v27  ;;  %v3135_v27 = vpop.f32.mrb[6].mxu0 }
 0x6ae   :  { %v2783_v28 = vpop.eup %2782 }
 0x6af   :  { %v612_v29 = vadd.f32 1.0, %v2783_v28  ;;  %v3137_v28 = vpop.f32.mrb[7].mxu0 }
 0x6b1   :  { %2784 = vrcp.f32 %v612_v29  ;;  %v3139_v29 = vpop.f32.mrb[8].mxu0 }
 0x6bb   :  { %v2785_v30 = vpop.eup %2784 }
 0x6bc   :  { %v615_v31 = vmul.f32 2.0, %v2785_v30  ;;  %v617_v39 = vmul.f32 %v2785_v30, %v528_v38 }
 0x6be   :  { %v2266_v33 = vadd.f32 -1.0, %v615_v31 }
 0x6c0   :  { %619 = vrot.lane.b32.xlu0 %v2266_v33, %s2924_s30 }
 0x6c4   :  { %639 = vperm.xlu0 %2769, %v637_v34  }
 0x732   :  { %v620_v35 = vpop.permute.xlu0 %619 }
 0x733   :  { %v622_v36 = vmul.f32 %v2785_v30, %v620_v35 }
 0x735   :  { %624 = vrot.lane.b32.xlu1 %v622_v36, %s2925_s8 }
 0x743   :  { %v640_v43 = vpop.permute.xlu0 %639 }
 0x744   :  { %vm641_vm10 = vcmp.eq.s32.totalorder %v640_v43, 1 }
 0x7a7   :  { %v625_v40 = vpop.permute.xlu1 %624 }
 0x7a8   :  { %v627_v41 = vadd.f32 %v625_v40, %v617_v39  ;;  %v211_v40 = vadd.f32 %v3036_v19, %v210_v25 }
 0x7aa   :  { %2786 = vtanh.f32 %v627_v41  ;;  %v3111_v62 = vsel %vm641_vm10, %v627_v41, %v528_v38 }
 0x7b4   :  { %v2787_v42 = vpop.eup %2786 }
 0x7b5   :  { %630 = vrot.lane.b32.xlu1 %v2787_v42, %s2924_s30 }
 0x827   :  { %v631_v44 = vpop.permute.xlu1 %630 }
 0x828   :  { %v633_v45 = vmul.f32 %v2785_v30, %v631_v44  ;;  %v3141_v30 = vpop.f32.mrb[9].mxu0 }
 0x829   :  { %v3143_v31 = vpop.f32.mrb[10].mxu0 }
 0x82a   :  { %v3093_v46 = vsel %vm641_vm10, %v633_v45, %v529_v16  ;;  %v61_v16 = vld [vmem:[#allocation5 + $0x68] sm:$0xff]  ;;  %v3145_v33 = vpop.f32.mrb[11].mxu0 }
 0x82b   :  { %647 = vrot.lane.b32.xlu1 %v3093_v46, %s2925_s8  ;;  %2454 = vmatmul.mubr.msk.f32.gmra.mrb[12].mxu0 %vm45_vm0, %v61_v16 }
 0x82c   :  { %2456 = vmatprep.mubr.msk.f32.mxu0 %vm45_vm0, %v62_v17 }
 0x82f   :  { %2457 = vmatmul.mubr.msk.f32.gmra.mrb[14].mxu0 %vm45_vm0, %v63_v18 }
 0x830   :  { %2511 = vmatprep.mubr.msk.f32.mxu0 %vm2920_vm1, %v2921_v1 }
 0x89d   :  { %v648_v47 = vpop.permute.xlu1 %647 }
 0x89e   :  { %2501 = vmatmul.mubr.msk.f32.vlgmr.msra.gmra.mrb[6].mxu1 %vm45_vm0, %v648_v47 }
 0x89f   :  { %2686 = vmatpush3.bf16.msra.mxu1 %v3005_v9  ;;  %2522 = vmatprep.mubr.msk.f32.mxu1 %vm2920_vm1, %v2921_v1 }
 0x8a0   :  { %2687 = vmatprep.subr.bf16.mxu1 %v2919_v0 }
 0x8a3   :  { %2689 = vmatpush3.bf16.msra.mxu1 %v3015_v14 }
 0x8a4   :  { %2696 = vmatprep.subr.bf16.mxu1 %v2919_v0 }
 0x8fe   :  { %v3147_v34 = vpop.f32.mrb[12].mxu0 }
 0x8ff   :  { %v3149_v35 = vpop.f32.mrb[13].mxu0 }
 0x902   :  { %v3151_v36 = vpop.f32.mrb[14].mxu0 }
 0x903   :  { %v3153_v38 = vpop.f32.mrb[15].mxu0 }
 0x971   :  { %v717_v49 = vpop.f32.mrb[6].mxu1 }
 0x972   :  { %v721_v50 = vadd.f32 %v717_v49, %v206_v48  ;;  %v2502_v51 = vpop.f32.mrb[7].mxu1 }
 0x973   :  { %v865_v51 = vsel %vm2275_vm13, 1, %v2923_v32  ;;  %vm2303_vm13 = vcmp.gt.s32.totalorder %v3049_v37, 11 }
 0x974   :  { %v722_v52 = vmul.f32 %v721_v50, %v3039_v26 }
 0x976   :  { %v2269_v53 = vmul.f32 -1.442695, %v722_v52 }
 0x978   :  { %2788 = vpow2.f32 %v2269_v53 }
 0x982   :  { %v2789_v54 = vpop.eup %2788 }
 0x983   :  { %v726_v55 = vadd.f32 1.0, %v2789_v54 }
 0x985   :  { %2790 = vrcp.f32 %v726_v55 }
 0x98f   :  { %v2791_v56 = vpop.eup %2790 }
 0x990   :  { %v729_v57 = vmul.f32 2.0, %v2791_v56  ;;  %v731_v63 = vmul.f32 %v2791_v56, %v3111_v62 }
 0x992   :  { %v2270_v58 = vadd.f32 -1.0, %v729_v57 }
 0x994   :  { %733 = vrot.lane.b32.xlu0 %v2270_v58, %s2924_s30 }
 0x998   :  { %753 = vperm.xlu0 %2769, %v751_v59  }
 0xa06   :  { %v734_v60 = vpop.permute.xlu0 %733 }
 0xa07   :  { %v736_v61 = vmul.f32 %v2791_v56, %v734_v60 }
 0xa09   :  { %738 = vrot.lane.b32.xlu1 %v736_v61, %s2925_s8 }
 0xa17   :  { %v754_v20 = vpop.permute.xlu0 %753 }
 0xa18   :  { %vm755_vm12 = vcmp.eq.s32.totalorder %v754_v20, 1 }
 0xa7b   :  { %v739_v2 = vpop.permute.xlu1 %738 }
 0xa7c   :  { %v3114_v3 = vadd.f32 %v739_v2, %v731_v63 }
 0xa7e   :  { %2792 = vtanh.f32 %v3114_v3  ;;  %v756_v54 = vsel %vm755_vm12, %v3114_v3, %v3111_v62  ;;  %v216_v62 = vadd.f32 %v2443_v24, %v3036_v19 }
 0xa88   :  { %v2793_v12 = vpop.eup %2792 }
 0xa89   :  { %744 = vrot.lane.b32.xlu1 %v2793_v12, %s2924_s30 }
 0xafb   :  { %v745_v21 = vpop.permute.xlu1 %744 }
 0xafc   :  { %v747_v22 = vmul.f32 %v2791_v56, %v745_v21 }
 0xafe   :  { %v757_v23 = vsel %vm755_vm12, %v747_v22, %v3093_v46 }
 0xaff   :  { %761 = vrot.lane.b32.xlu0 %v757_v23, %s2925_s8 }
 0xb71   :  { %v762_v39 = vpop.permute.xlu0 %761 }
 0xb72   :  { %2512 = vmatmul.mubr.msk.f32.vlgmr.msra.gmra.mrb[16].mxu0 %vm45_vm0, %v762_v39 }
 0xb73   :  { %2692 = vmatpush3.bf16.msra.mxu0 %v3005_v9  ;;  %2533 = vmatprep.mubr.msk.f32.mxu0 %vm2920_vm1, %v2921_v1 }
 0xb74   :  { %2693 = vmatprep.subr.bf16.mxu0 %v2919_v0 }
 0xb77   :  { %2695 = vmatpush3.bf16.msra.mxu0 %v3015_v14 }
 0xb78   :  { %2702 = vmatprep.subr.bf16.mxu0 %v2919_v0 }
 0xc45   :  { %v831_v41 = vpop.f32.mrb[16].mxu0 }
 0xc46   :  { %v835_v42 = vadd.f32 %v831_v41, %v211_v40  ;;  %v2513_v43 = vpop.f32.mrb[17].mxu0 }
 0xc48   :  { %v836_v44 = vmul.f32 %v835_v42, %v3039_v26  ;;  %v221_v42 = vadd.f32 %v3036_v19, %v3137_v28 }
 0xc4a   :  { %v2273_v45 = vmul.f32 -1.442695, %v836_v44 }
 0xc4c   :  { %2794 = vpow2.f32 %v2273_v45 }
 0xc56   :  { %v2795_v46 = vpop.eup %2794 }
 0xc57   :  { %v840_v47 = vadd.f32 1.0, %v2795_v46 }
 0xc59   :  { %2796 = vrcp.f32 %v840_v47 }
 0xc63   :  { %v2797_v48 = vpop.eup %2796 }
 0xc64   :  { %v843_v49 = vmul.f32 2.0, %v2797_v48  ;;  %v845_v55 = vmul.f32 %v2797_v48, %v756_v54 }
 0xc66   :  { %v2274_v50 = vadd.f32 -1.0, %v843_v49 }
 0xc68   :  { %847 = vrot.lane.b32.xlu1 %v2274_v50, %s2924_s30 }
 0xc6c   :  { %867 = vperm.xlu1 %2768, %v865_v51  }
 0xcda   :  { %v848_v52 = vpop.permute.xlu1 %847 }
 0xcdb   :  { %v850_v53 = vmul.f32 %v2797_v48, %v848_v52 }
 0xcdd   :  { %852 = vrot.lane.b32.xlu0 %v850_v53, %s2925_s8  ;;  %v1093_v53 = vsel %vm2283_vm3, 1, %v2923_v32 }
 0xceb   :  { %v868_v59 = vpop.permute.xlu1 %867 }
 0xcec   :  { %vm869_vm14 = vcmp.eq.s32.totalorder %v868_v59, 1 }
 0xd4f   :  { %v853_v56 = vpop.permute.xlu0 %852 }
 0xd50   :  { %v855_v57 = vadd.f32 %v853_v56, %v845_v55 }
 0xd52   :  { %2798 = vtanh.f32 %v855_v57  ;;  %v870_v18 = vsel %vm869_vm14, %v855_v57, %v756_v54 }
 0xd5c   :  { %v2799_v58 = vpop.eup %2798 }
 0xd5d   :  { %858 = vrot.lane.b32.xlu0 %v2799_v58, %s2924_s30 }
 0xdcf   :  { %v859_v60 = vpop.permute.xlu0 %858 }
 0xdd0   :  { %v861_v61 = vmul.f32 %v2797_v48, %v859_v60 }
 0xdd2   :  { %v871_v63 = vsel %vm869_vm14, %v861_v61, %v757_v23 }
 0xdd3   :  { %875 = vrot.lane.b32.xlu1 %v871_v63, %s2925_s8 }
 0xe45   :  { %v876_v2 = vpop.permute.xlu1 %875 }
 0xe46   :  { %2523 = vmatmul.mubr.msk.f32.vlgmr.msra.gmra.mrb[8].mxu1 %vm45_vm0, %v876_v2 }
 0xe47   :  { %2698 = vmatpush3.bf16.msra.mxu1 %v3005_v9  ;;  %2544 = vmatprep.mubr.msk.f32.mxu1 %vm2920_vm1, %v2921_v1 }
 0xe48   :  { %2699 = vmatprep.subr.bf16.mxu1 %v2919_v0 }
 0xe4b   :  { %2701 = vmatpush3.bf16.msra.mxu1 %v3015_v14 }
 0xe4c   :  { %2708 = vmatprep.subr.bf16.mxu1 %v2919_v0 }
 0xf19   :  { %v945_v3 = vpop.f32.mrb[8].mxu1 }
 0xf1a   :  { %v949_v4 = vadd.f32 %v945_v3, %v216_v62  ;;  %v2524_v5 = vpop.f32.mrb[9].mxu1  ;;  %v226_v3 = vadd.f32 %v3135_v27, %v3036_v19 }
 0xf1c   :  { %v950_v6 = vmul.f32 %v949_v4, %v3039_v26 }
 0xf1e   :  { %v2277_v7 = vmul.f32 -1.442695, %v950_v6 }
 0xf20   :  { %2800 = vpow2.f32 %v2277_v7 }
 0xf2a   :  { %v2801_v8 = vpop.eup %2800 }
 0xf2b   :  { %v954_v10 = vadd.f32 1.0, %v2801_v8 }
 0xf2d   :  { %2802 = vrcp.f32 %v954_v10 }
 0xf37   :  { %v2803_v11 = vpop.eup %2802 }
 0xf38   :  { %v957_v12 = vmul.f32 2.0, %v2803_v11  ;;  %v959_v20 = vmul.f32 %v2803_v11, %v870_v18 }
 0xf3a   :  { %v2278_v13 = vadd.f32 -1.0, %v957_v12 }
 0xf3c   :  { %961 = vrot.lane.b32.xlu0 %v2278_v13, %s2924_s30 }
 0xf40   :  { %981 = vperm.xlu0 %2769, %v979_v15  }
 0xfae   :  { %v962_v16 = vpop.permute.xlu0 %961 }
 0xfaf   :  { %v964_v17 = vmul.f32 %v2803_v11, %v962_v16  ;;  %v1207_v16 = vsel %vm2287_vm5, 1, %v2923_v32 }
 0xfb1   :  { %966 = vrot.lane.b32.xlu1 %v964_v17, %s2925_s8 }
 0xfbf   :  { %v982_v24 = vpop.permute.xlu0 %981 }
 0xfc0   :  { %vm983_vm2 = vcmp.eq.s32.totalorder %v982_v24, 1 }
0x1023   :  { %v967_v21 = vpop.permute.xlu1 %966 }
0x1024   :  { %v969_v22 = vadd.f32 %v967_v21, %v959_v20 }
0x1026   :  { %2804 = vtanh.f32 %v969_v22  ;;  %v984_v55 = vsel %vm983_vm2, %v969_v22, %v870_v18 }
0x1030   :  { %v2805_v23 = vpop.eup %2804 }
0x1031   :  { %972 = vrot.lane.b32.xlu1 %v2805_v23, %s2924_s30 }
0x10a3   :  { %v973_v25 = vpop.permute.xlu1 %972 }
0x10a4   :  { %v975_v39 = vmul.f32 %v2803_v11, %v973_v25 }
0x10a6   :  { %v985_v40 = vsel %vm983_vm2, %v975_v39, %v871_v63 }
0x10a7   :  { %989 = vrot.lane.b32.xlu0 %v985_v40, %s2925_s8 }
0x1119   :  { %v990_v41 = vpop.permute.xlu0 %989 }
0x111a   :  { %2534 = vmatmul.mubr.msk.f32.vlgmr.msra.gmra.mrb[18].mxu0 %vm45_vm0, %v990_v41 }
0x111b   :  { %2704 = vmatpush3.bf16.msra.mxu0 %v3005_v9  ;;  %2555 = vmatprep.mubr.msk.f32.mxu0 %vm2920_vm1, %v2921_v1 }
0x111c   :  { %2705 = vmatprep.subr.bf16.mxu0 %v2919_v0 }
0x111f   :  { %2707 = vmatpush3.bf16.msra.mxu0 %v3015_v14 }
0x1120   :  { %2714 = vmatprep.subr.bf16.mxu0 %v2919_v0 }
0x11ed   :  { %v1059_v43 = vpop.f32.mrb[18].mxu0 }
0x11ee   :  { %v1063_v44 = vadd.f32 %v1059_v43, %v221_v42  ;;  %v2535_v45 = vpop.f32.mrb[19].mxu0  ;;  %v231_v42 = vadd.f32 %v3036_v19, %v3141_v30 }
0x11f0   :  { %v1064_v46 = vmul.f32 %v1063_v44, %v3039_v26 }
0x11f2   :  { %v2281_v47 = vmul.f32 -1.442695, %v1064_v46 }
0x11f4   :  { %2806 = vpow2.f32 %v2281_v47 }
0x11fe   :  { %v2807_v48 = vpop.eup %2806 }
0x11ff   :  { %v1068_v49 = vadd.f32 1.0, %v2807_v48 }
0x1201   :  { %2808 = vrcp.f32 %v1068_v49 }
0x120b   :  { %v2809_v50 = vpop.eup %2808 }
0x120c   :  { %v1071_v51 = vmul.f32 2.0, %v2809_v50  ;;  %v1073_v56 = vmul.f32 %v2809_v50, %v984_v55 }
0x120e   :  { %v2282_v52 = vadd.f32 -1.0, %v1071_v51 }
0x1210   :  { %1075 = vrot.lane.b32.xlu1 %v2282_v52, %s2924_s30 }
0x1214   :  { %1095 = vperm.xlu1 %2768, %v1093_v53   ;;  %v1321_v53 = vsel %vm2291_vm7, 1, %v2923_v32 }
0x1282   :  { %v1076_v28 = vpop.permute.xlu1 %1075 }
0x1283   :  { %v1078_v54 = vmul.f32 %v2809_v50, %v1076_v28 }
0x1285   :  { %1080 = vrot.lane.b32.xlu0 %v1078_v54, %s2925_s8 }
0x1293   :  { %v1096_v60 = vpop.permute.xlu1 %1095 }
0x1294   :  { %vm1097_vm4 = vcmp.eq.s32.totalorder %v1096_v60, 1 }
0x12f7   :  { %v1081_v57 = vpop.permute.xlu0 %1080 }
0x12f8   :  { %v1083_v58 = vadd.f32 %v1081_v57, %v1073_v56 }
0x12fa   :  { %2810 = vtanh.f32 %v1083_v58  ;;  %v1098_v18 = vsel %vm1097_vm4, %v1083_v58, %v984_v55 }
0x1304   :  { %v2811_v59 = vpop.eup %2810 }
0x1305   :  { %1086 = vrot.lane.b32.xlu0 %v2811_v59, %s2924_s30 }
0x1377   :  { %v1087_v61 = vpop.permute.xlu0 %1086 }
0x1378   :  { %v1089_v63 = vmul.f32 %v2809_v50, %v1087_v61 }
0x137a   :  { %v1099_v2 = vsel %vm1097_vm4, %v1089_v63, %v985_v40 }
0x137b   :  { %1103 = vrot.lane.b32.xlu1 %v1099_v2, %s2925_s8 }
0x13ed   :  { %v1104_v62 = vpop.permute.xlu1 %1103 }
0x13ee   :  { %2545 = vmatmul.mubr.msk.f32.vlgmr.msra.gmra.mrb[10].mxu1 %vm45_vm0, %v1104_v62  ;;  %v236_v62 = vadd.f32 %v3139_v29, %v3036_v19 }
0x13ef   :  { %2710 = vmatpush3.bf16.msra.mxu1 %v3005_v9  ;;  %2566 = vmatprep.mubr.msk.f32.mxu1 %vm2920_vm1, %v2921_v1 }
0x13f0   :  { %2711 = vmatprep.subr.bf16.mxu1 %v2919_v0 }
0x13f3   :  { %2713 = vmatpush3.bf16.msra.mxu1 %v3015_v14 }
0x13f4   :  { %2720 = vmatprep.subr.bf16.mxu1 %v2919_v0 }
0x14c1   :  { %v1173_v4 = vpop.f32.mrb[10].mxu1 }
0x14c2   :  { %v1177_v5 = vadd.f32 %v1173_v4, %v226_v3  ;;  %v2546_v6 = vpop.f32.mrb[11].mxu1 }
0x14c4   :  { %v1178_v7 = vmul.f32 %v1177_v5, %v3039_v26 }
0x14c6   :  { %v2285_v8 = vmul.f32 -1.442695, %v1178_v7 }
0x14c8   :  { %2812 = vpow2.f32 %v2285_v8 }
0x14d2   :  { %v2813_v10 = vpop.eup %2812 }
0x14d3   :  { %v1182_v11 = vadd.f32 1.0, %v2813_v10 }
0x14d5   :  { %2814 = vrcp.f32 %v1182_v11 }
0x14df   :  { %v2815_v12 = vpop.eup %2814 }
0x14e0   :  { %v1185_v13 = vmul.f32 2.0, %v2815_v12  ;;  %v1187_v20 = vmul.f32 %v2815_v12, %v1098_v18 }
0x14e2   :  { %v2286_v15 = vadd.f32 -1.0, %v1185_v13 }
0x14e4   :  { %1189 = vrot.lane.b32.xlu0 %v2286_v15, %s2924_s30  ;;  %v1435_v15 = vsel %vm2295_vm9, 1, %v2923_v32 }
0x14e8   :  { %1209 = vperm.xlu0 %2769, %v1207_v16  }
0x1556   :  { %v1190_v27 = vpop.permute.xlu0 %1189 }
0x1557   :  { %v1192_v17 = vmul.f32 %v2815_v12, %v1190_v27 }
0x1559   :  { %1194 = vrot.lane.b32.xlu1 %v1192_v17, %s2925_s8 }
0x1567   :  { %v1210_v24 = vpop.permute.xlu0 %1209 }
0x1568   :  { %vm1211_vm6 = vcmp.eq.s32.totalorder %v1210_v24, 1 }
0x15cb   :  { %v1195_v21 = vpop.permute.xlu1 %1194 }
0x15cc   :  { %v1197_v22 = vadd.f32 %v1195_v21, %v1187_v20 }
0x15ce   :  { %2816 = vtanh.f32 %v1197_v22  ;;  %v1212_v54 = vsel %vm1211_vm6, %v1197_v22, %v1098_v18 }
0x15d8   :  { %v2817_v23 = vpop.eup %2816 }
0x15d9   :  { %1200 = vrot.lane.b32.xlu1 %v2817_v23, %s2924_s30 }
0x164b   :  { %v1201_v25 = vpop.permute.xlu1 %1200 }
0x164c   :  { %v1203_v39 = vmul.f32 %v2815_v12, %v1201_v25 }
0x164e   :  { %v1213_v40 = vsel %vm1211_vm6, %v1203_v39, %v1099_v2 }
0x164f   :  { %1217 = vrot.lane.b32.xlu0 %v1213_v40, %s2925_s8 }
0x16c1   :  { %v1218_v41 = vpop.permute.xlu0 %1217 }
0x16c2   :  { %2556 = vmatmul.mubr.msk.f32.vlgmr.msra.gmra.mrb[20].mxu0 %vm45_vm0, %v1218_v41 }
0x16c3   :  { %2716 = vmatpush3.bf16.msra.mxu0 %v3005_v9  ;;  %2577 = vmatprep.mubr.msk.f32.mxu0 %vm2920_vm1, %v2921_v1 }
0x16c4   :  { %2717 = vmatprep.subr.bf16.mxu0 %v2919_v0 }
0x16c7   :  { %2719 = vmatpush3.bf16.msra.mxu0 %v3015_v14 }
0x16c8   :  { %2726 = vmatprep.subr.bf16.mxu0 %v2919_v0 }
0x1795   :  { %v1287_v43 = vpop.f32.mrb[20].mxu0 }
0x1796   :  { %v1291_v44 = vadd.f32 %v1287_v43, %v231_v42  ;;  %v2557_v45 = vpop.f32.mrb[21].mxu0 }
0x1798   :  { %v1292_v46 = vmul.f32 %v1291_v44, %v3039_v26 }
0x179a   :  { %v2289_v47 = vmul.f32 -1.442695, %v1292_v46 }
0x179c   :  { %2818 = vpow2.f32 %v2289_v47 }
0x17a6   :  { %v2819_v48 = vpop.eup %2818 }
0x17a7   :  { %v1296_v49 = vadd.f32 1.0, %v2819_v48 }
0x17a9   :  { %2820 = vrcp.f32 %v1296_v49 }
0x17b3   :  { %v2821_v50 = vpop.eup %2820 }
0x17b4   :  { %v1299_v51 = vmul.f32 2.0, %v2821_v50  ;;  %v1301_v55 = vmul.f32 %v2821_v50, %v1212_v54 }
0x17b6   :  { %v2290_v52 = vadd.f32 -1.0, %v1299_v51  ;;  %v1549_v51 = vsel %vm2299_vm11, 1, %v2923_v32 }
0x17b8   :  { %1303 = vrot.lane.b32.xlu1 %v2290_v52, %s2924_s30 }
0x17bc   :  { %1323 = vperm.xlu1 %2768, %v1321_v53  }
0x182a   :  { %v1304_v30 = vpop.permute.xlu1 %1303 }
0x182b   :  { %v1306_v28 = vmul.f32 %v2821_v50, %v1304_v30 }
0x182d   :  { %1308 = vrot.lane.b32.xlu0 %v1306_v28, %s2925_s8 }
0x183b   :  { %v1324_v59 = vpop.permute.xlu1 %1323 }
0x183c   :  { %vm1325_vm8 = vcmp.eq.s32.totalorder %v1324_v59, 1 }
0x189f   :  { %v1309_v56 = vpop.permute.xlu0 %1308 }
0x18a0   :  { %v1311_v57 = vadd.f32 %v1309_v56, %v1301_v55 }
0x18a2   :  { %2822 = vtanh.f32 %v1311_v57  ;;  %v1326_v27 = vsel %vm1325_vm8, %v1311_v57, %v1212_v54 }
0x18ac   :  { %v2823_v58 = vpop.eup %2822 }
0x18ad   :  { %1314 = vrot.lane.b32.xlu0 %v2823_v58, %s2924_s30 }
0x191f   :  { %v1315_v60 = vpop.permute.xlu0 %1314 }
0x1920   :  { %v1317_v61 = vmul.f32 %v2821_v50, %v1315_v60 }
0x1922   :  { %v1327_v63 = vsel %vm1325_vm8, %v1317_v61, %v1213_v40  ;;  %v241_v40 = vadd.f32 %v3036_v19, %v3145_v33  ;;  %v246_v61 = vadd.f32 %v3143_v31, %v3036_v19  ;;  %vm2222_vm8 = vcmask 130048  }
0x1923   :  { %1331 = vrot.lane.b32.xlu1 %v1327_v63, %s2925_s8 }
0x1995   :  { %v1332_v2 = vpop.permute.xlu1 %1331 }
0x1996   :  { %2567 = vmatmul.mubr.msk.f32.vlgmr.msra.gmra.mrb[12].mxu1 %vm45_vm0, %v1332_v2 }
0x1997   :  { %2722 = vmatpush3.bf16.msra.mxu1 %v3005_v9  ;;  %2588 = vmatprep.mubr.msk.f32.mxu1 %vm2920_vm1, %v2921_v1 }
0x1998   :  { %2723 = vmatprep.subr.bf16.mxu1 %v2919_v0 }
0x199b   :  { %2725 = vmatpush3.bf16.msra.mxu1 %v3015_v14 }
0x199c   :  { %2732 = vmatprep.subr.bf16.mxu1 %v2919_v0 }
0x1a69   :  { %v1401_v3 = vpop.f32.mrb[12].mxu1 }
0x1a6a   :  { %v1405_v4 = vadd.f32 %v1401_v3, %v236_v62  ;;  %v2568_v5 = vpop.f32.mrb[13].mxu1 }
0x1a6c   :  { %v1406_v6 = vmul.f32 %v1405_v4, %v3039_v26 }
0x1a6e   :  { %v2293_v7 = vmul.f32 -1.442695, %v1406_v6 }
0x1a70   :  { %2824 = vpow2.f32 %v2293_v7 }
0x1a7a   :  { %v2825_v8 = vpop.eup %2824 }
0x1a7b   :  { %v1410_v10 = vadd.f32 1.0, %v2825_v8 }
0x1a7d   :  { %2826 = vrcp.f32 %v1410_v10 }
0x1a87   :  { %v2827_v11 = vpop.eup %2826 }
0x1a88   :  { %v1413_v12 = vmul.f32 2.0, %v2827_v11  ;;  %v1415_v17 = vmul.f32 %v2827_v11, %v1326_v27 }
0x1a8a   :  { %v2294_v13 = vadd.f32 -1.0, %v1413_v12 }
0x1a8c   :  { %1417 = vrot.lane.b32.xlu0 %v2294_v13, %s2924_s30 }
0x1a90   :  { %1437 = vperm.xlu0 %2769, %v1435_v15  }
0x1afe   :  { %v1418_v29 = vpop.permute.xlu0 %1417 }
0x1aff   :  { %v1420_v16 = vmul.f32 %v2827_v11, %v1418_v29 }
0x1b01   :  { %1422 = vrot.lane.b32.xlu1 %v1420_v16, %s2925_s8 }
0x1b0f   :  { %v1438_v22 = vpop.permute.xlu0 %1437 }
0x1b10   :  { %vm1439_vm10 = vcmp.eq.s32.totalorder %v1438_v22, 1 }
0x1b73   :  { %v1423_v18 = vpop.permute.xlu1 %1422 }
0x1b74   :  { %v1425_v20 = vadd.f32 %v1423_v18, %v1415_v17 }
0x1b76   :  { %2828 = vtanh.f32 %v1425_v20  ;;  %v1440_v53 = vsel %vm1439_vm10, %v1425_v20, %v1326_v27 }
0x1b80   :  { %v2829_v21 = vpop.eup %2828 }
0x1b81   :  { %1428 = vrot.lane.b32.xlu1 %v2829_v21, %s2924_s30  ;;  %v3309_v21 = vld [vmem:[%s3405_s4] ss:$0 sm:$0xff] }
0x1b82   :  { %v251_v22 = vadd.f32 %v3309_v21, %v3149_v35 }
0x1bf3   :  { %v1429_v23 = vpop.permute.xlu1 %1428 }
0x1bf4   :  { %v1431_v24 = vmul.f32 %v2827_v11, %v1429_v23  ;;  %v1663_v11 = vsel %vm2303_vm13, 1, %v2923_v32 }
0x1bf6   :  { %v1441_v25 = vsel %vm1439_vm10, %v1431_v24, %v1327_v63 }
0x1bf7   :  { %1445 = vrot.lane.b32.xlu0 %v1441_v25, %s2925_s8 }
0x1c69   :  { %v1446_v39 = vpop.permute.xlu0 %1445 }
0x1c6a   :  { %2578 = vmatmul.mubr.msk.f32.vlgmr.msra.gmra.mrb[22].mxu0 %vm45_vm0, %v1446_v39 }
0x1c6b   :  { %2728 = vmatpush3.bf16.msra.mxu0 %v3005_v9  ;;  %2599 = vmatprep.mubr.msk.f32.mxu0 %vm2920_vm1, %v2921_v1 }
0x1c6c   :  { %2729 = vmatprep.subr.bf16.mxu0 %v2919_v0 }
0x1c6f   :  { %2731 = vmatpush3.bf16.msra.mxu0 %v3015_v14 }
0x1c70   :  { %2738 = vmatprep.subr.bf16.mxu0 %v2919_v0 }
0x1d3d   :  { %v1515_v41 = vpop.f32.mrb[22].mxu0 }
0x1d3e   :  { %v1519_v42 = vadd.f32 %v1515_v41, %v241_v40  ;;  %v2579_v43 = vpop.f32.mrb[23].mxu0 }
0x1d40   :  { %v1520_v44 = vmul.f32 %v1519_v42, %v3039_v26 }
0x1d42   :  { %v2297_v45 = vmul.f32 -1.442695, %v1520_v44 }
0x1d44   :  { %2830 = vpow2.f32 %v2297_v45 }
0x1d4e   :  { %v2831_v46 = vpop.eup %2830 }
0x1d4f   :  { %v1524_v47 = vadd.f32 1.0, %v2831_v46  ;;  %v3317_v46 = vld [vmem:[%s3402_s1] sm:$0xff] }
0x1d50   :  { %vm2307_vm15 = vcmp.gt.s32.totalorder %v3317_v46, 12  ;;  %vm2311_vm3 = vcmp.gt.s32.totalorder %v3317_v46, 13  ;;  %vm2315_vm5 = vcmp.gt.s32.totalorder %v3317_v46, 14  ;;  %vm2319_vm6 = vcmp.gt.s32.totalorder %v3317_v46, 15  ;;  %v2140_v46 = vld [vmem:[%s3406_s5 + $0x8] sm:$0xff] }
0x1d51   :  { %2832 = vrcp.f32 %v1524_v47  ;;  %v1777_v35 = vsel %vm2307_vm15, 1, %v2923_v32 }
0x1d5b   :  { %v2833_v48 = vpop.eup %2832 }
0x1d5c   :  { %v1527_v49 = vmul.f32 2.0, %v2833_v48  ;;  %v1529_v30 = vmul.f32 %v2833_v48, %v1440_v53 }
0x1d5e   :  { %v2298_v50 = vadd.f32 -1.0, %v1527_v49 }
0x1d60   :  { %1531 = vrot.lane.b32.xlu1 %v2298_v50, %s2924_s30 }
0x1d64   :  { %1551 = vperm.xlu1 %2768, %v1549_v51  }
0x1dd2   :  { %v1532_v33 = vpop.permute.xlu1 %1531 }
0x1dd3   :  { %v1534_v52 = vmul.f32 %v2833_v48, %v1532_v33 }
0x1dd5   :  { %1536 = vrot.lane.b32.xlu0 %v1534_v52, %s2925_s8 }
0x1de3   :  { %v1552_v56 = vpop.permute.xlu1 %1551 }
0x1de4   :  { %vm1553_vm12 = vcmp.eq.s32.totalorder %v1552_v56, 1  ;;  %v256_v56 = vadd.f32 %v3309_v21, %v3147_v34 }
0x1e47   :  { %v1537_v28 = vpop.permute.xlu0 %1536 }
0x1e48   :  { %v1539_v54 = vadd.f32 %v1537_v28, %v1529_v30 }
0x1e4a   :  { %2834 = vtanh.f32 %v1539_v54  ;;  %v1554_v12 = vsel %vm1553_vm12, %v1539_v54, %v1440_v53 }
0x1e54   :  { %v2835_v55 = vpop.eup %2834 }
0x1e55   :  { %1542 = vrot.lane.b32.xlu0 %v2835_v55, %s2924_s30 }
0x1ec7   :  { %v1543_v57 = vpop.permute.xlu0 %1542 }
0x1ec8   :  { %v1545_v58 = vmul.f32 %v2833_v48, %v1543_v57 }
0x1eca   :  { %v1555_v59 = vsel %vm1553_vm12, %v1545_v58, %v1441_v25 }
0x1ecb   :  { %1559 = vrot.lane.b32.xlu1 %v1555_v59, %s2925_s8 }
0x1f3d   :  { %v1560_v60 = vpop.permute.xlu1 %1559 }
0x1f3e   :  { %2589 = vmatmul.mubr.msk.f32.vlgmr.msra.gmra.mrb[14].mxu1 %vm45_vm0, %v1560_v60 }
0x1f3f   :  { %2734 = vmatpush3.bf16.msra.mxu1 %v3005_v9  ;;  %2610 = vmatprep.mubr.msk.f32.mxu1 %vm2920_vm1, %v2921_v1 }
0x1f40   :  { %2735 = vmatprep.subr.bf16.mxu1 %v2919_v0 }
0x1f43   :  { %2737 = vmatpush3.bf16.msra.mxu1 %v3015_v14 }
0x1f44   :  { %2744 = vmatprep.subr.bf16.mxu1 %v2919_v0 }
0x2011   :  { %v1629_v63 = vpop.f32.mrb[14].mxu1 }
0x2012   :  { %v1633_v2 = vadd.f32 %v1629_v63, %v246_v61  ;;  %v2590_v62 = vpop.f32.mrb[15].mxu1 }
0x2014   :  { %v1634_v3 = vmul.f32 %v1633_v2, %v3039_v26 }
0x2016   :  { %v2301_v4 = vmul.f32 -1.442695, %v1634_v3 }
0x2018   :  { %2836 = vpow2.f32 %v2301_v4 }
0x2022   :  { %v2837_v5 = vpop.eup %2836 }
0x2023   :  { %v1638_v6 = vadd.f32 1.0, %v2837_v5 }
0x2025   :  { %2838 = vrcp.f32 %v1638_v6 }
0x202f   :  { %v2839_v7 = vpop.eup %2838 }
0x2030   :  { %v1641_v8 = vmul.f32 2.0, %v2839_v7  ;;  %v1643_v13 = vmul.f32 %v2839_v7, %v1554_v12 }
0x2032   :  { %v2302_v10 = vadd.f32 -1.0, %v1641_v8 }
0x2034   :  { %1645 = vrot.lane.b32.xlu0 %v2302_v10, %s2924_s30 }
0x2038   :  { %1665 = vperm.xlu0 %2769, %v1663_v11  }
0x20a6   :  { %v1646_v19 = vpop.permute.xlu0 %1645 }
0x20a7   :  { %v1648_v31 = vmul.f32 %v2839_v7, %v1646_v19 }
0x20a9   :  { %1650 = vrot.lane.b32.xlu1 %v1648_v31, %s2925_s8 }
0x20b7   :  { %v1666_v27 = vpop.permute.xlu0 %1665 }
0x20b8   :  { %vm1667_vm14 = vcmp.eq.s32.totalorder %v1666_v27, 1 }
0x211b   :  { %v1651_v15 = vpop.permute.xlu1 %1650 }
0x211c   :  { %v1653_v29 = vadd.f32 %v1651_v15, %v1643_v13  ;;  %v261_v15 = vadd.f32 %v3309_v21, %v3153_v38 }
0x211e   :  { %2840 = vtanh.f32 %v1653_v29  ;;  %v1668_v49 = vsel %vm1667_vm14, %v1653_v29, %v1554_v12 }
0x2128   :  { %v2841_v16 = vpop.eup %2840 }
0x2129   :  { %1656 = vrot.lane.b32.xlu1 %v2841_v16, %s2924_s30 }
0x219b   :  { %v1657_v37 = vpop.permute.xlu1 %1656 }
0x219c   :  { %v1659_v17 = vmul.f32 %v2839_v7, %v1657_v37 }
0x219e   :  { %v1669_v18 = vsel %vm1667_vm14, %v1659_v17, %v1555_v59 }
0x219f   :  { %1673 = vrot.lane.b32.xlu0 %v1669_v18, %s2925_s8 }
0x2211   :  { %v1674_v20 = vpop.permute.xlu0 %1673 }
0x2212   :  { %2600 = vmatmul.mubr.msk.f32.vlgmr.msra.gmra.mrb[24].mxu0 %vm45_vm0, %v1674_v20 }
0x2213   :  { %2740 = vmatpush3.bf16.msra.mxu0 %v3005_v9  ;;  %2621 = vmatprep.mubr.msk.f32.mxu0 %vm2920_vm1, %v2921_v1 }
0x2214   :  { %2741 = vmatprep.subr.bf16.mxu0 %v2919_v0 }
0x2217   :  { %2743 = vmatpush3.bf16.msra.mxu0 %v3015_v14 }
0x2218   :  { %2750 = vmatprep.subr.bf16.mxu0 %v2919_v0 }
0x22e5   :  { %v1743_v23 = vpop.f32.mrb[24].mxu0 }
0x22e6   :  { %v1747_v24 = vadd.f32 %v1743_v23, %v251_v22  ;;  %v2601_v25 = vpop.f32.mrb[25].mxu0 }
0x22e8   :  { %v1748_v39 = vmul.f32 %v1747_v24, %v3039_v26 }
0x22ea   :  { %v2305_v40 = vmul.f32 -1.442695, %v1748_v39 }
0x22ec   :  { %2842 = vpow2.f32 %v2305_v40 }
0x22f6   :  { %v2843_v41 = vpop.eup %2842 }
0x22f7   :  { %v1752_v42 = vadd.f32 1.0, %v2843_v41 }
0x22f9   :  { %2844 = vrcp.f32 %v1752_v42 }
0x2303   :  { %v2845_v43 = vpop.eup %2844 }
0x2304   :  { %v1755_v44 = vmul.f32 2.0, %v2845_v43  ;;  %v1757_v50 = vmul.f32 %v2845_v43, %v1668_v49 }
0x2306   :  { %v2306_v45 = vadd.f32 -1.0, %v1755_v44 }
0x2308   :  { %1759 = vrot.lane.b32.xlu1 %v2306_v45, %s2924_s30 }
0x230c   :  { %1779 = vperm.xlu1 %2768, %v1777_v35  }
0x237a   :  { %v1760_v47 = vpop.permute.xlu1 %1759 }
0x237b   :  { %v1762_v48 = vmul.f32 %v2845_v43, %v1760_v47 }
0x237d   :  { %1764 = vrot.lane.b32.xlu0 %v1762_v48, %s2925_s8 }
0x238b   :  { %v1780_v53 = vpop.permute.xlu1 %1779 }
0x238c   :  { %vm1781_vm2 = vcmp.eq.s32.totalorder %v1780_v53, 1 }
0x23ef   :  { %v1765_v51 = vpop.permute.xlu0 %1764 }
0x23f0   :  { %v1767_v33 = vadd.f32 %v1765_v51, %v1757_v50 }
0x23f2   :  { %2846 = vtanh.f32 %v1767_v33  ;;  %v1782_v5 = vsel %vm1781_vm2, %v1767_v33, %v1668_v49  ;;  %v266_v49 = vadd.f32 %v3309_v21, %v3151_v36 }
0x23fc   :  { %v2847_v52 = vpop.eup %2846 }
0x23fd   :  { %1770 = vrot.lane.b32.xlu0 %v2847_v52, %s2924_s30 }
0x246f   :  { %v1771_v30 = vpop.permute.xlu0 %1770 }
0x2470   :  { %v1773_v28 = vmul.f32 %v2845_v43, %v1771_v30 }
0x2472   :  { %v1783_v54 = vsel %vm1781_vm2, %v1773_v28, %v1669_v18 }
0x2473   :  { %1787 = vrot.lane.b32.xlu1 %v1783_v54, %s2925_s8 }
0x24e5   :  { %v1788_v55 = vpop.permute.xlu1 %1787 }
0x24e6   :  { %2611 = vmatmul.mubr.msk.f32.vlgmr.msra.gmra.mrb[16].mxu1 %vm45_vm0, %v1788_v55 }
0x24e7   :  { %2746 = vmatpush3.bf16.msra.mxu1 %v3005_v9  ;;  %2632 = vmatprep.mubr.msk.f32.mxu1 %vm2920_vm1, %v2921_v1 }
0x24e8   :  { %2747 = vmatprep.subr.bf16.mxu1 %v2919_v0 }
0x24eb   :  { %2749 = vmatpush3.bf16.msra.mxu1 %v3015_v14  ;;  %v1891_v14 = vsel %vm2311_vm3, 1, %v2923_v32 }
0x25b9   :  { %v1857_v57 = vpop.f32.mrb[16].mxu1 }
0x25ba   :  { %v1861_v58 = vadd.f32 %v1857_v57, %v256_v56  ;;  %v2612_v59 = vpop.f32.mrb[17].mxu1  ;;  %v2119_v57 = vsel %vm2319_vm6, 1, %v2923_v32 }
0x25bc   :  { %v1862_v60 = vmul.f32 %v1861_v58, %v3039_v26 }
0x25be   :  { %v2309_v61 = vmul.f32 -1.442695, %v1862_v60 }
0x25c0   :  { %2848 = vpow2.f32 %v2309_v61  ;;  %v2139_v61 = vld [vmem:[%s3406_s5] sm:$0xff] }
0x25ca   :  { %v2849_v63 = vpop.eup %2848 }
0x25cb   :  { %v1866_v2 = vadd.f32 1.0, %v2849_v63  ;;  %v2751_v63 = vpack.c.bf16 %v2140_v46, %v2139_v61 }
0x25cd   :  { %2850 = vrcp.f32 %v1866_v2  ;;  %v2142_v2 = vld [vmem:[%s3406_s5 + $0x18] sm:$0xff] }
0x25d7   :  { %v2851_v9 = vpop.eup %2850 }
0x25d8   :  { %v1869_v62 = vmul.f32 2.0, %v2851_v9  ;;  %v1871_v6 = vmul.f32 %v2851_v9, %v1782_v5 }
0x25da   :  { %v2310_v3 = vadd.f32 -1.0, %v1869_v62 }
0x25dc   :  { %1873 = vrot.lane.b32.xlu0 %v2310_v3, %s2924_s30 }
0x25e0   :  { %1893 = vperm.xlu0 %2769, %v1891_v14  }
0x264e   :  { %v1874_v34 = vpop.permute.xlu0 %1873 }
0x264f   :  { %v1876_v4 = vmul.f32 %v2851_v9, %v1874_v34 }
0x2651   :  { %1878 = vrot.lane.b32.xlu1 %v1876_v4, %s2925_s8 }
0x265f   :  { %v1894_v11 = vpop.permute.xlu0 %1893 }
0x2660   :  { %vm1895_vm4 = vcmp.eq.s32.totalorder %v1894_v11, 1 }
0x26c3   :  { %v1879_v7 = vpop.permute.xlu1 %1878 }
0x26c4   :  { %v1881_v8 = vadd.f32 %v1879_v7, %v1871_v6 }
0x26c6   :  { %2852 = vtanh.f32 %v1881_v8  ;;  %v1896_v39 = vsel %vm1895_vm4, %v1881_v8, %v1782_v5 }
0x26d0   :  { %v2853_v10 = vpop.eup %2852 }
0x26d1   :  { %1884 = vrot.lane.b32.xlu1 %v2853_v10, %s2924_s30 }
0x2743   :  { %v1885_v19 = vpop.permute.xlu1 %1884 }
0x2744   :  { %v1887_v31 = vmul.f32 %v2851_v9, %v1885_v19 }
0x2746   :  { %v1897_v12 = vsel %vm1895_vm4, %v1887_v31, %v1783_v54 }
0x2747   :  { %1901 = vrot.lane.b32.xlu0 %v1897_v12, %s2925_s8 }
0x27b9   :  { %v1902_v13 = vpop.permute.xlu0 %1901 }
0x27ba   :  { %2622 = vmatmul.mubr.msk.f32.vlgmr.msra.gmra.mrb[26].mxu0 %vm45_vm0, %v1902_v13 }
0x27bb   :  { %2643 = vmatprep.mubr.msk.f32.mxu0 %vm2920_vm1, %v2921_v1  ;;  %v2005_v1 = vsel %vm2315_vm5, 1, %v2923_v32  ;;  %v2141_v32 = vld [vmem:[%s3406_s5 + $0x10] sm:$0xff]  ;;  %2752 = vmatpush3.bf16.msra.mxu0 %v2751_v63 }
0x27bc   :  { %v2754_v9 = vpack.c.bf16 %v2142_v2, %v2141_v32  ;;  %2753 = vmatprep.subr.bf16.mxu0 %v2919_v0  ;;  %v2320_v0 = vld [vmem:[%s3407_s6] ss:$0 sm:$0xff] }
0x27bf   :  { %2755 = vmatpush3.bf16.msra.mxu0 %v2754_v9 }
0x288d   :  { %v1971_v29 = vpop.f32.mrb[26].mxu0 }
0x288e   :  { %v1975_v16 = vadd.f32 %v1971_v29, %v261_v15  ;;  %v2623_v27 = vpop.f32.mrb[27].mxu0 }
0x2890   :  { %v1976_v37 = vmul.f32 %v1975_v16, %v3039_v26 }
0x2892   :  { %v2313_v17 = vmul.f32 -1.442695, %v1976_v37 }
0x2894   :  { %2854 = vpow2.f32 %v2313_v17 }
0x289e   :  { %v2855_v18 = vpop.eup %2854 }
0x289f   :  { %v1980_v20 = vadd.f32 1.0, %v2855_v18 }
0x28a1   :  { %2856 = vrcp.f32 %v1980_v20 }
0x28ab   :  { %v2857_v22 = vpop.eup %2856 }
0x28ac   :  { %v1983_v23 = vmul.f32 2.0, %v2857_v22  ;;  %v1985_v40 = vmul.f32 %v2857_v22, %v1896_v39 }
0x28ae   :  { %v2314_v24 = vadd.f32 -1.0, %v1983_v23 }
0x28b0   :  { %1987 = vrot.lane.b32.xlu1 %v2314_v24, %s2924_s30 }
0x28b4   :  { %2007 = vperm.xlu1 %2768, %v2005_v1  }
0x2922   :  { %v1988_v38 = vpop.permute.xlu1 %1987 }
0x2923   :  { %v1990_v25 = vmul.f32 %v2857_v22, %v1988_v38 }
0x2925   :  { %1992 = vrot.lane.b32.xlu0 %v1990_v25, %s2925_s8 }
0x2933   :  { %v2008_v44 = vpop.permute.xlu1 %2007 }
0x2934   :  { %vm2009_vm1 = vcmp.eq.s32.totalorder %v2008_v44, 1 }
0x2997   :  { %v1993_v41 = vpop.permute.xlu0 %1992 }
0x2998   :  { %v1995_v42 = vadd.f32 %v1993_v41, %v1985_v40 }
0x299a   :  { %2858 = vtanh.f32 %v1995_v42 }
0x29a4   :  { %v2859_v43 = vpop.eup %2858 }
0x29a5   :  { %1998 = vrot.lane.b32.xlu0 %v2859_v43, %s2924_s30 }
0x2a17   :  { %v1999_v45 = vpop.permute.xlu0 %1998 }
0x2a18   :  { %v2001_v35 = vmul.f32 %v2857_v22, %v1999_v45 }
0x2a1a   :  { %v2011_v47 = vsel %vm2009_vm1, %v2001_v35, %v1897_v12 }
0x2a1b   :  { %2015 = vrot.lane.b32.xlu1 %v2011_v47, %s2925_s8 }
0x2a8d   :  { %v2016_v48 = vpop.permute.xlu1 %2015 }
0x2a8e   :  { %2633 = vmatmul.mubr.msk.f32.vlgmr.msra.gmra.mrb[18].mxu1 %vm45_vm0, %v2016_v48 }
0x2b61   :  { %v2085_v50 = vpop.f32.mrb[18].mxu1 }
0x2b62   :  { %v2089_v51 = vadd.f32 %v2085_v50, %v266_v49  ;;  %v2634_v33 = vpop.f32.mrb[19].mxu1 }
0x2b64   :  { %v2090_v52 = vmul.f32 %v2089_v51, %v3039_v26  ;;  %v2010_v26 = vsel %vm2009_vm1, %v1995_v42, %v1896_v39 }
0x2b66   :  { %v2317_v53 = vmul.f32 -1.442695, %v2090_v52 }
0x2b68   :  { %2860 = vpow2.f32 %v2317_v53 }
0x2b72   :  { %v2861_v30 = vpop.eup %2860 }
0x2b73   :  { %v2094_v28 = vadd.f32 1.0, %v2861_v30 }
0x2b75   :  { %2862 = vrcp.f32 %v2094_v28 }
0x2b7f   :  { %v2863_v54 = vpop.eup %2862 }
0x2b80   :  { %v2097_v55 = vmul.f32 2.0, %v2863_v54  ;;  %v2099_v58 = vmul.f32 %v2863_v54, %v2010_v26 }
0x2b82   :  { %v2318_v56 = vadd.f32 -1.0, %v2097_v55 }
0x2b84   :  { %2101 = vrot.lane.b32.xlu0 %v2318_v56, %s2924_s30 }
0x2b88   :  { %2121 = vperm.xlu0 %2769, %v2119_v57  }
0x2bf6   :  { %v2102_v36 = vpop.permute.xlu0 %2101 }
0x2bf7   :  { %v2104_v21 = vmul.f32 %v2863_v54, %v2102_v36 }
0x2bf9   :  { %2106 = vrot.lane.b32.xlu1 %v2104_v21, %s2925_s8 }
0x2c07   :  { %v2122_v3 = vpop.permute.xlu0 %2121 }
0x2c08   :  { %vm2123_vm7 = vcmp.eq.s32.totalorder %v2122_v3, 1 }
0x2c6b   :  { %v2107_v59 = vpop.permute.xlu1 %2106 }
0x2c6c   :  { %v2109_v60 = vadd.f32 %v2107_v59, %v2099_v58 }
0x2c6e   :  { %2864 = vtanh.f32 %v2109_v60  ;;  %v2124_v14 = vsel %vm2123_vm7, %v2109_v60, %v2010_v26 }
0x2c78   :  { %v2865_v62 = vpop.eup %2864 }
0x2c79   :  { %2112 = vrot.lane.b32.xlu1 %v2865_v62, %s2924_s30 }
0x2c7d   :  { %2132 = vrot.lane.b32.xlu1 %v2124_v14, %s2926_s11 }
0x2ceb   :  { %v2113_v34 = vpop.permute.xlu1 %2112 }
0x2cec   :  { %v2115_v4 = vmul.f32 %v2863_v54, %v2113_v34 }
0x2cee   :  { %v2125_v5 = vsel %vm2123_vm7, %v2115_v4, %v2011_v47 }
0x2cef   :  { %2127 = vrot.lane.b32.xlu0 %v2125_v5, %s2925_s8  ;;  %v2133_v6 = vpop.permute.xlu1 %2132 }
0x2cf0   :  { %2135 = vst.msk [vmem:[#allocation3] sm:$0xff] %vm45_vm0, %v2133_v6 }
0x2d61   :  { %v2128_v7 = vpop.permute.xlu0 %2127 }
0x2d62   :  { %2130 = vst.msk [vmem:[#allocation2] sm:$0xff] %vm45_vm0, %v2128_v7  ;;  %2644 = vmatmul.mubr.msk.f32.vlgmr.msra.gmra.mrb[28].mxu0 %vm45_vm0, %v2128_v7 }
0x2e35   :  { %v2218_v8 = vpop.f32.mrb[28].mxu0 }
0x2e36   :  { %v2219_v10 = vadd.f32 %v2320_v0, %v2218_v8  ;;  %v2645_v11 = vpop.f32.mrb[29].mxu0 }
0x2e38   :  { %2223 = vst.msk [vmem:[#allocation8] sm:$0xff] %vm2222_vm8, %v2219_v10 }
0x2e39   :  { %2901 = shalt.err (!%p2898_p12)
}
0x2e3a   :  { %s2902_s27 = scalar_lea.hbm %s3408_s7, 128 }
0x2e3b   :  { %p2903_p13 = scmp.ne.s32.totalorder %s3408_s7, %s2902_s27  ;;  %p2906_p0 = scmp.lt.u32.totalorder %s2902_s27, %s3408_s7 }
0x2e3d   :  { %p2908_p1 = pnand %p2906_p0, %p2903_p13 }
0x2e3f   :  { %2911 = shalt.err (!%p2908_p1)
}
0x2e40   :  { %2233 = dma.vmem_to_hbm [thread:$0]  %s2231_s23, 128, %s3408_s7, [#allocation7]  }
0x2e41   :  { %2914 = dma.done.wait [#allocation7], 128  }
0x2e42   :  { %2915 = vsyncadd [#allocation7], 4294967168 }
0x2e43   :  { %2237 = vsyncpa [#allocation6], 1 }
0x2e44   :  { %2238 = vsyncpa [#allocation7], 1 }

</bundles_post_ra>
